<compile_context>
chip_gen: v6e
topology: v6e:2x2x1
jax: 0.10.0
libtpu: 0.0.40
codegen_flags: <defaults>
</compile_context>

<pallas_src>
import functools

import jax
import jax.numpy as jnp
from jax.experimental import pallas as pl
from jax.experimental.pallas import tpu as pltpu

VMEM = pltpu.MemorySpace.VMEM
F32 = jnp.float32
BF16 = jnp.bfloat16


def _layernorm(h, g, b, eps=1e-5):
    mu = jnp.mean(h, axis=-1, keepdims=True)
    var = jnp.mean(jnp.square(h - mu), axis=-1, keepdims=True)
    return (h - mu) * jax.lax.rsqrt(var + eps) * g + b


def _mm(a, b):
    # bf16 MXU matmul, f32 accumulation
    return jnp.dot(a.astype(BF16), b.astype(BF16), preferred_element_type=F32)


# ----------------------------------------------------------------------------
# Single fused forward kernel
# ----------------------------------------------------------------------------
def _gcn_fused_kernel(
        # data
        x_ref, t_ref, mask_ref, adj_ref, batch_ref, srci_ref, dsti_ref,
        # embedder / encoder params
        emb_w_ref, emb_b_ref, emb_tw_ref,
        wq_ref, wk_ref, wv_ref, wo_ref, bo_ref,
        ln1g_ref, ln1b_ref, ffw1_ref, ffb1_ref, ffw2_ref, ffb2_ref,
        ln2g_ref, ln2b_ref,
        # 3x SAGE resnet params (stacked on a leading layer axis)
        sage_wl_ref, sage_wr_ref, sage_b_ref,
        # pair-query head params (head_w1 pre-split into 3 C-row blocks)
        hw1_ref, hb1_ref, hw2_ref, hb2_ref, hw3_ref, hb3_ref, hw4_ref, hb4_ref,
        # outputs
        node_ref, srcemb_ref, dstemb_ref, gemb_ref, pred_ref,
        *, num_graphs, scale):
    # ---- TransformerEmbedder: input projection + learned scalar-time encoding ----
    h = _mm(x_ref[...], emb_w_ref[...]) + emb_b_ref[...] + t_ref[...] * emb_tw_ref[...]

    # ---- 1-layer, 1-head transformer encoder (key-padding mask) ----
    q = _mm(h, wq_ref[...])
    k = _mm(h, wk_ref[...])
    v = _mm(h, wv_ref[...])
    # contract last dims directly (no transpose of k)
    s = jax.lax.dot_general(q.astype(BF16), k.astype(BF16),
                            (((1,), (1,)), ((), ())),
                            preferred_element_type=F32) * scale
    s = jnp.where(mask_ref[...] > 0.0, s, -1e30)          # mask invalid keys
    s = s - jnp.max(s, axis=-1, keepdims=True)
    p = jnp.exp(s)
    p = p * pl.reciprocal(jnp.sum(p, axis=-1, keepdims=True), approx=True)
    attn = _mm(_mm(p, v), wo_ref[...]) + bo_ref[...]
    h = _layernorm(h + attn, ln1g_ref[...], ln1b_ref[...])
    ff = jnp.maximum(_mm(h, ffw1_ref[...]) + ffb1_ref[...], 0.0)
    ff = _mm(ff, ffw2_ref[...]) + ffb2_ref[...]
    h = _layernorm(h + ff, ln2g_ref[...], ln2b_ref[...])

    # ---- 3x GCNResnet(SAGEConv, mean agg):  x + gelu(lin_l(A x) + lin_r(x)) ----
    adj = adj_ref[...]                                     # bf16, loaded once, reused 3x
    for l in range(3):
        agg = _mm(adj, h)
        y = _mm(agg, sage_wl_ref[l]) + _mm(h, sage_wr_ref[l]) + sage_b_ref[l]
        h = h + jax.nn.gelu(y, approximate=True)
    node_ref[...] = h

    # ---- global_max_pool via graph-membership one-hot; result stays in VMEM ----
    n = h.shape[0]
    onehot_b = (batch_ref[...] ==
                jax.lax.broadcasted_iota(jnp.int32, (n, num_graphs), 1)).astype(F32)
    neg = jnp.float32(-3.0e38)
    rows = []
    for g in range(num_graphs):                            # static, small graph count
        m = onehot_b[:, g:g + 1]
        rows.append(jnp.max(jnp.where(m > 0.0, h, neg), axis=0, keepdims=True))
    pooled = jnp.concatenate(rows, axis=0)                 # (G, C)

    # ---- exact gathers via 0/1 one-hot matmuls (f32 selectors) ----
    nq = srci_ref.shape[0]
    onehot_src = (srci_ref[...] ==
                  jax.lax.broadcasted_iota(jnp.int32, (nq, n), 1)).astype(F32)
    onehot_dst = (dsti_ref[...] ==
                  jax.lax.broadcasted_iota(jnp.int32, (nq, n), 1)).astype(F32)
    src_emb = jnp.dot(onehot_src, h, preferred_element_type=F32)          # (Q, C)
    dst_emb = jnp.dot(onehot_dst, h, preferred_element_type=F32)          # (Q, C)
    sel_g = jnp.dot(onehot_src, onehot_b, preferred_element_type=F32)     # (Q, G)
    g_emb = jnp.dot(sel_g, pooled, preferred_element_type=F32)            # (Q, C)
    srcemb_ref[...] = src_emb
    dstemb_ref[...] = dst_emb
    gemb_ref[...] = g_emb

    # ---- pair head: both branches stacked to (2Q, .), head_w1 split in 3 blocks ----
    a_stack = jnp.concatenate([src_emb, dst_emb], axis=0)  # (2Q, C)  xy | yx "src" slot
    b_stack = jnp.concatenate([dst_emb, src_emb], axis=0)  # (2Q, C)  xy | yx "dst" slot
    g_stack = jnp.concatenate([g_emb, g_emb], axis=0)      # (2Q, C)
    h1 = (_mm(a_stack, hw1_ref[0]) + _mm(b_stack, hw1_ref[1]) +
          _mm(g_stack, hw1_ref[2]) + hb1_ref[...])
    h1 = jnp.maximum(h1, 0.0)
    h2 = jnp.maximum(_mm(h1, hw2_ref[...]) + hb2_ref[...], 0.0)
    h3 = jnp.maximum(_mm(h2, hw3_ref[...]) + hb3_ref[...], 0.0)
    pred_ref[...] = _mm(h3, hw4_ref[...]) + hb4_ref[...]   # (2Q, 1)


# ----------------------------------------------------------------------------
# Glue (plain JAX): parameter init, adjacency build, wrapper
# ----------------------------------------------------------------------------
def init_params(key, in_feat, c):
    f_ff = 2 * c
    shapes = [
        ("emb_w", (in_feat, c)), ("emb_b", (1, c)), ("emb_tw", (1, c)),
        ("wq", (c, c)), ("wk", (c, c)), ("wv", (c, c)), ("wo", (c, c)), ("bo", (1, c)),
        ("ffn_w1", (c, f_ff)), ("ffn_b1", (1, f_ff)),
        ("ffn_w2", (f_ff, c)), ("ffn_b2", (1, c)),
    ]
    for l in (1, 2, 3):
        shapes += [(f"sage{l}_wl", (c, c)), (f"sage{l}_wr", (c, c)), (f"sage{l}_b", (1, c))]
    shapes += [
        ("head_w1", (3 * c, 2 * c)), ("head_b1", (1, 2 * c)),
        ("head_w2", (2 * c, 2 * c)), ("head_b2", (1, 2 * c)),
        ("head_w3", (2 * c, 2 * c)), ("head_b3", (1, 2 * c)),
        ("head_w4", (2 * c, 1)), ("head_b4", (1, 1)),
    ]
    keys = jax.random.split(key, len(shapes))
    p = {}
    for (name, shape), k in zip(shapes, keys):
        fan_in = shape[0] if shape[0] > 1 else shape[-1]
        p[name] = jax.random.normal(k, shape, F32) / jnp.sqrt(jnp.float32(fan_in))
    p["ln1_g"] = jnp.ones((1, c), F32)
    p["ln1_b"] = jnp.zeros((1, c), F32)
    p["ln2_g"] = jnp.ones((1, c), F32)
    p["ln2_b"] = jnp.zeros((1, c), F32)
    return p


def dense_mean_adjacency(edge_index, n):
    src, dst = edge_index[0], edge_index[1]
    a = jnp.zeros((n, n), F32).at[dst, src].add(1.0)
    deg = jnp.sum(a, axis=1, keepdims=True)
    return a / jnp.maximum(deg, 1.0)


@functools.partial(jax.jit, static_argnames=("num_graphs",))
def gcn_forward(params, x, edge_index, mask, times, batch_vec, src_idx, dst_idx, num_graphs):
    n = x.shape[0]
    q = src_idx.shape[0]
    c = params["emb_w"].shape[1]

    adj = dense_mean_adjacency(edge_index, n).astype(BF16)
    mask_row = mask.astype(F32).reshape(1, n)
    batch_col = batch_vec.astype(jnp.int32).reshape(n, 1)
    src_col = src_idx.astype(jnp.int32).reshape(q, 1)
    dst_col = dst_idx.astype(jnp.int32).reshape(q, 1)

    bf = lambda name: params[name].astype(BF16)
    sage_wl = jnp.stack([params["sage1_wl"], params["sage2_wl"], params["sage3_wl"]]).astype(BF16)
    sage_wr = jnp.stack([params["sage1_wr"], params["sage2_wr"], params["sage3_wr"]]).astype(BF16)
    sage_b = jnp.stack([params["sage1_b"], params["sage2_b"], params["sage3_b"]])          # f32
    hw1 = params["head_w1"].reshape(3, c, 2 * c).astype(BF16)   # split (3C,2C) -> 3x(C,2C)

    kernel = functools.partial(_gcn_fused_kernel,
                               num_graphs=num_graphs,
                               scale=1.0 / float(c) ** 0.5)
    n_in = 34
    out_shapes = (
        jax.ShapeDtypeStruct((n, c), F32),        # node embeddings
        jax.ShapeDtypeStruct((q, c), F32),        # src_emb
        jax.ShapeDtypeStruct((q, c), F32),        # dst_emb
        jax.ShapeDtypeStruct((q, c), F32),        # graph_emb[src]
        jax.ShapeDtypeStruct((2 * q, 1), F32),    # [predxy ; predyx]
    )
    node_emb, src_emb, dst_emb, g_emb, pred = pl.pallas_call(
        kernel,
        out_shape=out_shapes,
        in_specs=[pl.BlockSpec(memory_space=VMEM)] * n_in,
        out_specs=tuple(pl.BlockSpec(memory_space=VMEM) for _ in range(len(out_shapes))),
    )(
        x.astype(BF16), times.astype(F32), mask_row, adj, batch_col, src_col, dst_col,
        bf("emb_w"), params["emb_b"], params["emb_tw"],
        bf("wq"), bf("wk"), bf("wv"), bf("wo"), params["bo"],
        params["ln1_g"], params["ln1_b"],
        bf("ffn_w1"), params["ffn_b1"], bf("ffn_w2"), params["ffn_b2"],
        params["ln2_g"], params["ln2_b"],
        sage_wl, sage_wr, sage_b,
        hw1, params["head_b1"],
        bf("head_w2"), params["head_b2"],
        bf("head_w3"), params["head_b3"],
        bf("head_w4"), params["head_b4"],
    )

    xy = jnp.concatenate([src_emb, dst_emb, g_emb], axis=-1)   # (Q, 3C)  required output
    predxy = pred[:q]
    predyx = pred[q:]
    return node_emb, (predxy, predyx), xy


# ----------------------------------------------------------------------------
if __name__ == "__main__":
    key = jax.random.PRNGKey(0)
    N, G = 16, 2            # 16 nodes, 2 graphs of 8 nodes
    NB_POINTS = 128         # per-node input feature dim (module's nb_points)
    C = 64                  # out_channels
    E, Q = 32, 8            # edges, query pairs

    k_p, k_x, k_t, k_e1, k_e2, k_e3, k_e4, k_s, k_d = jax.random.split(key, 9)
    params = init_params(k_p, NB_POINTS, C)

    x = jax.random.normal(k_x, (N, NB_POINTS), F32)
    times = jax.random.normal(k_t, (N, 1), F32)
    mask = jnp.ones((N,), F32)                              # all nodes valid
    batch_vec = jnp.repeat(jnp.arange(G, dtype=jnp.int32), N // G)

    # edges constrained to stay within their graph
    src = jnp.concatenate([jax.random.randint(k_e1, (E // 2,), 0, N // 2),
                           jax.random.randint(k_e2, (E // 2,), N // 2, N)])
    dst = jnp.concatenate([jax.random.randint(k_e3, (E // 2,), 0, N // 2),
                           jax.random.randint(k_e4, (E // 2,), N // 2, N)])
    edge_index = jnp.stack([src, dst]).astype(jnp.int32)

    src_idx = jax.random.randint(k_s, (Q,), 0, N)
    dst_idx = jax.random.randint(k_d, (Q,), 0, N)

    node_emb, (predxy, predyx), xy = gcn_forward(
        params, x, edge_index, mask, times, batch_vec, src_idx, dst_idx, num_graphs=G)
    jax.block_until_ready((node_emb, predxy, predyx, xy))

    assert node_emb.shape == (N, C)
    assert predxy.shape == (Q, 1) and predyx.shape == (Q, 1)
    assert xy.shape == (Q, 3 * C)
    assert not bool(jnp.isnan(node_emb).any())
    assert not bool(jnp.isnan(predxy).any()) and not bool(jnp.isnan(predyx).any())
    assert not bool(jnp.isnan(xy).any())
    print("KERNEL_OK")
</pallas_src>

<mosaic_0001>
module attributes {stable_mosaic.version = 11 : i64} {
  func.func private @main(%arg0: i32) attributes {dimension_semantics = [#tpu.dimension_semantics<core_parallel>], iteration_bounds = array<i64: 2>, tpu.core_type = #tpu.core_type<sc_scalar_subcore>, window_params = []} {
    return
  }
}

module attributes {stable_mosaic.version = 11 : i64} {
  func.func private @main(%arg0: i32) attributes {dimension_semantics = [#tpu.dimension_semantics<core_parallel>], iteration_bounds = array<i64: 2>, tpu.core_type = #tpu.core_type<sc_scalar_subcore>, window_params = []} {
    return
  }
}

module attributes {stable_mosaic.version = 11 : i64} {
  func.func @_gcn_fused_kernel(%arg0: memref<16x128xbf16, #tpu.memory_space<vmem>>, %arg1: memref<16x1xf32, #tpu.memory_space<vmem>>, %arg2: memref<1x16xf32, #tpu.memory_space<vmem>>, %arg3: memref<16x16xbf16, #tpu.memory_space<vmem>>, %arg4: memref<16x1xi32, #tpu.memory_space<vmem>>, %arg5: memref<8x1xi32, #tpu.memory_space<vmem>>, %arg6: memref<8x1xi32, #tpu.memory_space<vmem>>, %arg7: memref<128x64xbf16, #tpu.memory_space<vmem>>, %arg8: memref<1x64xf32, #tpu.memory_space<vmem>>, %arg9: memref<1x64xf32, #tpu.memory_space<vmem>>, %arg10: memref<64x64xbf16, #tpu.memory_space<vmem>>, %arg11: memref<64x64xbf16, #tpu.memory_space<vmem>>, %arg12: memref<64x64xbf16, #tpu.memory_space<vmem>>, %arg13: memref<64x64xbf16, #tpu.memory_space<vmem>>, %arg14: memref<1x64xf32, #tpu.memory_space<vmem>>, %arg15: memref<1x64xf32, #tpu.memory_space<vmem>>, %arg16: memref<1x64xf32, #tpu.memory_space<vmem>>, %arg17: memref<64x128xbf16, #tpu.memory_space<vmem>>, %arg18: memref<1x128xf32, #tpu.memory_space<vmem>>, %arg19: memref<128x64xbf16, #tpu.memory_space<vmem>>, %arg20: memref<1x64xf32, #tpu.memory_space<vmem>>, %arg21: memref<1x64xf32, #tpu.memory_space<vmem>>, %arg22: memref<1x64xf32, #tpu.memory_space<vmem>>, %arg23: memref<3x64x64xbf16, #tpu.memory_space<vmem>>, %arg24: memref<3x64x64xbf16, #tpu.memory_space<vmem>>, %arg25: memref<3x1x64xf32, #tpu.memory_space<vmem>>, %arg26: memref<3x64x128xbf16, #tpu.memory_space<vmem>>, %arg27: memref<1x128xf32, #tpu.memory_space<vmem>>, %arg28: memref<128x128xbf16, #tpu.memory_space<vmem>>, %arg29: memref<1x128xf32, #tpu.memory_space<vmem>>, %arg30: memref<128x128xbf16, #tpu.memory_space<vmem>>, %arg31: memref<1x128xf32, #tpu.memory_space<vmem>>, %arg32: memref<128x1xbf16, #tpu.memory_space<vmem>>, %arg33: memref<1x1xf32, #tpu.memory_space<vmem>>, %arg34: memref<16x64xf32, #tpu.memory_space<vmem>>, %arg35: memref<8x64xf32, #tpu.memory_space<vmem>>, %arg36: memref<8x64xf32, #tpu.memory_space<vmem>>, %arg37: memref<8x64xf32, #tpu.memory_space<vmem>>, %arg38: memref<16x1xf32, #tpu.memory_space<vmem>>) attributes {dimension_semantics = [], scalar_prefetch = 0 : i64, scratch_operands = 0 : i64, tpu.core_type = #tpu.core_type<tc>} {
    %c0 = arith.constant 0 : index
    %c0_0 = arith.constant 0 : index
    %0 = vector.load %arg0[%c0, %c0_0] : memref<16x128xbf16, #tpu.memory_space<vmem>>, vector<16x128xbf16>
    %c0_1 = arith.constant 0 : index
    %c0_2 = arith.constant 0 : index
    %1 = vector.load %arg7[%c0_1, %c0_2] : memref<128x64xbf16, #tpu.memory_space<vmem>>, vector<128x64xbf16>
    %cst = arith.constant dense<0.000000e+00> : vector<16x64xf32>
    %2 = tpu.matmul %0, %1, %cst {dimension_numbers = #tpu.dot_dimension_numbers<[1], [0], [0], [1], [0, 0, 1, 1], [], []>} : vector<16x128xbf16>, vector<128x64xbf16>, vector<16x64xf32> -> vector<16x64xf32>
    %c0_3 = arith.constant 0 : index
    %c0_4 = arith.constant 0 : index
    %3 = vector.load %arg8[%c0_3, %c0_4] : memref<1x64xf32, #tpu.memory_space<vmem>>, vector<1x64xf32>
    %4 = vector.broadcast %3 : vector<1x64xf32> to vector<16x64xf32>
    %5 = arith.addf %2, %4 : vector<16x64xf32>
    %c0_5 = arith.constant 0 : index
    %c0_6 = arith.constant 0 : index
    %6 = vector.load %arg1[%c0_5, %c0_6] : memref<16x1xf32, #tpu.memory_space<vmem>>, vector<16x1xf32>
    %c0_7 = arith.constant 0 : index
    %c0_8 = arith.constant 0 : index
    %7 = vector.load %arg9[%c0_7, %c0_8] : memref<1x64xf32, #tpu.memory_space<vmem>>, vector<1x64xf32>
    %8 = vector.broadcast %6 : vector<16x1xf32> to vector<16x64xf32>
    %9 = vector.broadcast %7 : vector<1x64xf32> to vector<16x64xf32>
    %10 = arith.mulf %8, %9 : vector<16x64xf32>
    %11 = arith.addf %5, %10 : vector<16x64xf32>
    %c0_9 = arith.constant 0 : index
    %c0_10 = arith.constant 0 : index
    %12 = vector.load %arg10[%c0_9, %c0_10] : memref<64x64xbf16, #tpu.memory_space<vmem>>, vector<64x64xbf16>
    %13 = arith.truncf %11 : vector<16x64xf32> to vector<16x64xbf16>
    %cst_11 = arith.constant dense<0.000000e+00> : vector<16x64xf32>
    %14 = tpu.matmul %13, %12, %cst_11 {dimension_numbers = #tpu.dot_dimension_numbers<[1], [0], [0], [1], [0, 0, 1, 1], [], []>} : vector<16x64xbf16>, vector<64x64xbf16>, vector<16x64xf32> -> vector<16x64xf32>
    %c0_12 = arith.constant 0 : index
    %c0_13 = arith.constant 0 : index
    %15 = vector.load %arg11[%c0_12, %c0_13] : memref<64x64xbf16, #tpu.memory_space<vmem>>, vector<64x64xbf16>
    %16 = arith.truncf %11 : vector<16x64xf32> to vector<16x64xbf16>
    %cst_14 = arith.constant dense<0.000000e+00> : vector<16x64xf32>
    %17 = tpu.matmul %16, %15, %cst_14 {dimension_numbers = #tpu.dot_dimension_numbers<[1], [0], [0], [1], [0, 0, 1, 1], [], []>} : vector<16x64xbf16>, vector<64x64xbf16>, vector<16x64xf32> -> vector<16x64xf32>
    %c0_15 = arith.constant 0 : index
    %c0_16 = arith.constant 0 : index
    %18 = vector.load %arg12[%c0_15, %c0_16] : memref<64x64xbf16, #tpu.memory_space<vmem>>, vector<64x64xbf16>
    %19 = arith.truncf %11 : vector<16x64xf32> to vector<16x64xbf16>
    %cst_17 = arith.constant dense<0.000000e+00> : vector<16x64xf32>
    %20 = tpu.matmul %19, %18, %cst_17 {dimension_numbers = #tpu.dot_dimension_numbers<[1], [0], [0], [1], [0, 0, 1, 1], [], []>} : vector<16x64xbf16>, vector<64x64xbf16>, vector<16x64xf32> -> vector<16x64xf32>
    %21 = arith.truncf %14 : vector<16x64xf32> to vector<16x64xbf16>
    %22 = arith.truncf %17 : vector<16x64xf32> to vector<16x64xbf16>
    %cst_18 = arith.constant dense<0.000000e+00> : vector<16x16xf32>
    %23 = tpu.matmul %21, %22, %cst_18 {dimension_numbers = #tpu.dot_dimension_numbers<[1], [1], [0], [0], [0, 0, 1, 0], [], []>} : vector<16x64xbf16>, vector<16x64xbf16>, vector<16x16xf32> -> vector<16x16xf32>
    %cst_19 = arith.constant 1.250000e-01 : f32
    %24 = vector.broadcast %cst_19 : f32 to vector<16x16xf32>
    %25 = arith.mulf %23, %24 : vector<16x16xf32>
    %c0_20 = arith.constant 0 : index
    %c0_21 = arith.constant 0 : index
    %26 = vector.load %arg2[%c0_20, %c0_21] : memref<1x16xf32, #tpu.memory_space<vmem>>, vector<1x16xf32>
    %cst_22 = arith.constant 0.000000e+00 : f32
    %27 = vector.broadcast %cst_22 : f32 to vector<1x16xf32>
    %28 = arith.cmpf ogt, %26, %27 : vector<1x16xf32>
    %cst_23 = arith.constant -1.000000e+30 : f32
    %29 = vector.shape_cast %28 : vector<1x16xi1> to vector<1x16xi1>
    %30 = vector.broadcast %29 : vector<1x16xi1> to vector<16x16xi1>
    %31 = vector.broadcast %cst_23 : f32 to vector<16x16xf32>
    %32 = arith.select %30, %25, %31 : vector<16x16xi1>, vector<16x16xf32>
    %cst_24 = arith.constant dense<0xFF800000> : vector<16xf32>
    %33 = vector.multi_reduction <maximumf>, %32, %cst_24 [1] : vector<16x16xf32> to vector<16xf32>
    %34 = vector.shape_cast %33 : vector<16xf32> to vector<16x1xf32>
    %35 = vector.broadcast %34 : vector<16x1xf32> to vector<16x16xf32>
    %36 = arith.subf %32, %35 : vector<16x16xf32>
    %37 = math.exp %36 : vector<16x16xf32>
    %cst_25 = arith.constant dense<0.000000e+00> : vector<16xf32>
    %38 = vector.multi_reduction <add>, %37, %cst_25 [1] : vector<16x16xf32> to vector<16xf32>
    %39 = vector.shape_cast %38 : vector<16xf32> to vector<16x1xf32>
    %40 = tpu.reciprocal %39 {approx = true} : vector<16x1xf32> -> vector<16x1xf32>
    %41 = vector.broadcast %40 : vector<16x1xf32> to vector<16x16xf32>
    %42 = arith.mulf %37, %41 : vector<16x16xf32>
    %43 = arith.truncf %42 : vector<16x16xf32> to vector<16x16xbf16>
    %44 = arith.truncf %20 : vector<16x64xf32> to vector<16x64xbf16>
    %cst_26 = arith.constant dense<0.000000e+00> : vector<16x64xf32>
    %45 = tpu.matmul %43, %44, %cst_26 {dimension_numbers = #tpu.dot_dimension_numbers<[1], [0], [0], [1], [0, 0, 1, 1], [], []>} : vector<16x16xbf16>, vector<16x64xbf16>, vector<16x64xf32> -> vector<16x64xf32>
    %c0_27 = arith.constant 0 : index
    %c0_28 = arith.constant 0 : index
    %46 = vector.load %arg13[%c0_27, %c0_28] : memref<64x64xbf16, #tpu.memory_space<vmem>>, vector<64x64xbf16>
    %47 = arith.truncf %45 : vector<16x64xf32> to vector<16x64xbf16>
    %cst_29 = arith.constant dense<0.000000e+00> : vector<16x64xf32>
    %48 = tpu.matmul %47, %46, %cst_29 {dimension_numbers = #tpu.dot_dimension_numbers<[1], [0], [0], [1], [0, 0, 1, 1], [], []>} : vector<16x64xbf16>, vector<64x64xbf16>, vector<16x64xf32> -> vector<16x64xf32>
    %c0_30 = arith.constant 0 : index
    %c0_31 = arith.constant 0 : index
    %49 = vector.load %arg14[%c0_30, %c0_31] : memref<1x64xf32, #tpu.memory_space<vmem>>, vector<1x64xf32>
    %50 = vector.broadcast %49 : vector<1x64xf32> to vector<16x64xf32>
    %51 = arith.addf %48, %50 : vector<16x64xf32>
    %52 = arith.addf %11, %51 : vector<16x64xf32>
    %c0_32 = arith.constant 0 : index
    %c0_33 = arith.constant 0 : index
    %53 = vector.load %arg15[%c0_32, %c0_33] : memref<1x64xf32, #tpu.memory_space<vmem>>, vector<1x64xf32>
    %c0_34 = arith.constant 0 : index
    %c0_35 = arith.constant 0 : index
    %54 = vector.load %arg16[%c0_34, %c0_35] : memref<1x64xf32, #tpu.memory_space<vmem>>, vector<1x64xf32>
    %cst_36 = arith.constant dense<0.000000e+00> : vector<16xf32>
    %55 = vector.multi_reduction <add>, %52, %cst_36 [1] : vector<16x64xf32> to vector<16xf32>
    %56 = vector.shape_cast %55 : vector<16xf32> to vector<16x1xf32>
    %cst_37 = arith.constant 6.400000e+01 : f32
    %57 = vector.broadcast %cst_37 : f32 to vector<16x1xf32>
    %58 = arith.divf %56, %57 : vector<16x1xf32>
    %59 = vector.broadcast %58 : vector<16x1xf32> to vector<16x64xf32>
    %60 = arith.subf %52, %59 : vector<16x64xf32>
    %61 = arith.mulf %60, %60 : vector<16x64xf32>
    %cst_38 = arith.constant dense<0.000000e+00> : vector<16xf32>
    %62 = vector.multi_reduction <add>, %61, %cst_38 [1] : vector<16x64xf32> to vector<16xf32>
    %63 = vector.shape_cast %62 : vector<16xf32> to vector<16x1xf32>
    %cst_39 = arith.constant 6.400000e+01 : f32
    %64 = vector.broadcast %cst_39 : f32 to vector<16x1xf32>
    %65 = arith.divf %63, %64 : vector<16x1xf32>
    %66 = vector.broadcast %58 : vector<16x1xf32> to vector<16x64xf32>
    %67 = arith.subf %52, %66 : vector<16x64xf32>
    %cst_40 = arith.constant 9.99999974E-6 : f32
    %68 = vector.broadcast %cst_40 : f32 to vector<16x1xf32>
    %69 = arith.addf %65, %68 : vector<16x1xf32>
    %70 = math.rsqrt %69 : vector<16x1xf32>
    %71 = vector.broadcast %70 : vector<16x1xf32> to vector<16x64xf32>
    %72 = arith.mulf %67, %71 : vector<16x64xf32>
    %73 = vector.broadcast %53 : vector<1x64xf32> to vector<16x64xf32>
    %74 = arith.mulf %72, %73 : vector<16x64xf32>
    %75 = vector.broadcast %54 : vector<1x64xf32> to vector<16x64xf32>
    %76 = arith.addf %74, %75 : vector<16x64xf32>
    %c0_41 = arith.constant 0 : index
    %c0_42 = arith.constant 0 : index
    %77 = vector.load %arg17[%c0_41, %c0_42] : memref<64x128xbf16, #tpu.memory_space<vmem>>, vector<64x128xbf16>
    %78 = arith.truncf %76 : vector<16x64xf32> to vector<16x64xbf16>
    %cst_43 = arith.constant dense<0.000000e+00> : vector<16x128xf32>
    %79 = tpu.matmul %78, %77, %cst_43 {dimension_numbers = #tpu.dot_dimension_numbers<[1], [0], [0], [1], [0, 0, 1, 1], [], []>} : vector<16x64xbf16>, vector<64x128xbf16>, vector<16x128xf32> -> vector<16x128xf32>
    %c0_44 = arith.constant 0 : index
    %c0_45 = arith.constant 0 : index
    %80 = vector.load %arg18[%c0_44, %c0_45] : memref<1x128xf32, #tpu.memory_space<vmem>>, vector<1x128xf32>
    %81 = vector.broadcast %80 : vector<1x128xf32> to vector<16x128xf32>
    %82 = arith.addf %79, %81 : vector<16x128xf32>
    %cst_46 = arith.constant 0.000000e+00 : f32
    %83 = vector.broadcast %cst_46 : f32 to vector<16x128xf32>
    %84 = arith.maximumf %82, %83 : vector<16x128xf32>
    %c0_47 = arith.constant 0 : index
    %c0_48 = arith.constant 0 : index
    %85 = vector.load %arg19[%c0_47, %c0_48] : memref<128x64xbf16, #tpu.memory_space<vmem>>, vector<128x64xbf16>
    %86 = arith.truncf %84 : vector<16x128xf32> to vector<16x128xbf16>
    %cst_49 = arith.constant dense<0.000000e+00> : vector<16x64xf32>
    %87 = tpu.matmul %86, %85, %cst_49 {dimension_numbers = #tpu.dot_dimension_numbers<[1], [0], [0], [1], [0, 0, 1, 1], [], []>} : vector<16x128xbf16>, vector<128x64xbf16>, vector<16x64xf32> -> vector<16x64xf32>
    %c0_50 = arith.constant 0 : index
    %c0_51 = arith.constant 0 : index
    %88 = vector.load %arg20[%c0_50, %c0_51] : memref<1x64xf32, #tpu.memory_space<vmem>>, vector<1x64xf32>
    %89 = vector.broadcast %88 : vector<1x64xf32> to vector<16x64xf32>
    %90 = arith.addf %87, %89 : vector<16x64xf32>
    %91 = arith.addf %76, %90 : vector<16x64xf32>
    %c0_52 = arith.constant 0 : index
    %c0_53 = arith.constant 0 : index
    %92 = vector.load %arg21[%c0_52, %c0_53] : memref<1x64xf32, #tpu.memory_space<vmem>>, vector<1x64xf32>
    %c0_54 = arith.constant 0 : index
    %c0_55 = arith.constant 0 : index
    %93 = vector.load %arg22[%c0_54, %c0_55] : memref<1x64xf32, #tpu.memory_space<vmem>>, vector<1x64xf32>
    %cst_56 = arith.constant dense<0.000000e+00> : vector<16xf32>
    %94 = vector.multi_reduction <add>, %91, %cst_56 [1] : vector<16x64xf32> to vector<16xf32>
    %95 = vector.shape_cast %94 : vector<16xf32> to vector<16x1xf32>
    %cst_57 = arith.constant 6.400000e+01 : f32
    %96 = vector.broadcast %cst_57 : f32 to vector<16x1xf32>
    %97 = arith.divf %95, %96 : vector<16x1xf32>
    %98 = vector.broadcast %97 : vector<16x1xf32> to vector<16x64xf32>
    %99 = arith.subf %91, %98 : vector<16x64xf32>
    %100 = arith.mulf %99, %99 : vector<16x64xf32>
    %cst_58 = arith.constant dense<0.000000e+00> : vector<16xf32>
    %101 = vector.multi_reduction <add>, %100, %cst_58 [1] : vector<16x64xf32> to vector<16xf32>
    %102 = vector.shape_cast %101 : vector<16xf32> to vector<16x1xf32>
    %cst_59 = arith.constant 6.400000e+01 : f32
    %103 = vector.broadcast %cst_59 : f32 to vector<16x1xf32>
    %104 = arith.divf %102, %103 : vector<16x1xf32>
    %105 = vector.broadcast %97 : vector<16x1xf32> to vector<16x64xf32>
    %106 = arith.subf %91, %105 : vector<16x64xf32>
    %cst_60 = arith.constant 9.99999974E-6 : f32
    %107 = vector.broadcast %cst_60 : f32 to vector<16x1xf32>
    %108 = arith.addf %104, %107 : vector<16x1xf32>
    %109 = math.rsqrt %108 : vector<16x1xf32>
    %110 = vector.broadcast %109 : vector<16x1xf32> to vector<16x64xf32>
    %111 = arith.mulf %106, %110 : vector<16x64xf32>
    %112 = vector.broadcast %92 : vector<1x64xf32> to vector<16x64xf32>
    %113 = arith.mulf %111, %112 : vector<16x64xf32>
    %114 = vector.broadcast %93 : vector<1x64xf32> to vector<16x64xf32>
    %115 = arith.addf %113, %114 : vector<16x64xf32>
    %c0_61 = arith.constant 0 : index
    %c0_62 = arith.constant 0 : index
    %116 = vector.load %arg3[%c0_61, %c0_62] : memref<16x16xbf16, #tpu.memory_space<vmem>>, vector<16x16xbf16>
    %117 = arith.truncf %115 : vector<16x64xf32> to vector<16x64xbf16>
    %cst_63 = arith.constant dense<0.000000e+00> : vector<16x64xf32>
    %118 = tpu.matmul %116, %117, %cst_63 {dimension_numbers = #tpu.dot_dimension_numbers<[1], [0], [0], [1], [0, 0, 1, 1], [], []>} : vector<16x16xbf16>, vector<16x64xbf16>, vector<16x64xf32> -> vector<16x64xf32>
    %c0_64 = arith.constant 0 : index
    %c0_65 = arith.constant 0 : index
    %c0_66 = arith.constant 0 : index
    %119 = vector.load %arg23[%c0_64, %c0_65, %c0_66] : memref<3x64x64xbf16, #tpu.memory_space<vmem>>, vector<1x64x64xbf16>
    %120 = vector.shape_cast %119 : vector<1x64x64xbf16> to vector<64x64xbf16>
    %121 = arith.truncf %118 : vector<16x64xf32> to vector<16x64xbf16>
    %cst_67 = arith.constant dense<0.000000e+00> : vector<16x64xf32>
    %122 = tpu.matmul %121, %120, %cst_67 {dimension_numbers = #tpu.dot_dimension_numbers<[1], [0], [0], [1], [0, 0, 1, 1], [], []>} : vector<16x64xbf16>, vector<64x64xbf16>, vector<16x64xf32> -> vector<16x64xf32>
    %c0_68 = arith.constant 0 : index
    %c0_69 = arith.constant 0 : index
    %c0_70 = arith.constant 0 : index
    %123 = vector.load %arg24[%c0_68, %c0_69, %c0_70] : memref<3x64x64xbf16, #tpu.memory_space<vmem>>, vector<1x64x64xbf16>
    %124 = vector.shape_cast %123 : vector<1x64x64xbf16> to vector<64x64xbf16>
    %125 = arith.truncf %115 : vector<16x64xf32> to vector<16x64xbf16>
    %cst_71 = arith.constant dense<0.000000e+00> : vector<16x64xf32>
    %126 = tpu.matmul %125, %124, %cst_71 {dimension_numbers = #tpu.dot_dimension_numbers<[1], [0], [0], [1], [0, 0, 1, 1], [], []>} : vector<16x64xbf16>, vector<64x64xbf16>, vector<16x64xf32> -> vector<16x64xf32>
    %127 = arith.addf %122, %126 : vector<16x64xf32>
    %c0_72 = arith.constant 0 : index
    %c0_73 = arith.constant 0 : index
    %c0_74 = arith.constant 0 : index
    %128 = vector.load %arg25[%c0_72, %c0_73, %c0_74] : memref<3x1x64xf32, #tpu.memory_space<vmem>>, vector<1x1x64xf32>
    %129 = vector.shape_cast %128 : vector<1x1x64xf32> to vector<1x64xf32>
    %130 = vector.broadcast %129 : vector<1x64xf32> to vector<16x64xf32>
    %131 = arith.addf %127, %130 : vector<16x64xf32>
    %132 = arith.mulf %131, %131 : vector<16x64xf32>
    %133 = arith.mulf %131, %132 : vector<16x64xf32>
    %cst_75 = arith.constant 4.471500e-02 : f32
    %134 = vector.broadcast %cst_75 : f32 to vector<16x64xf32>
    %135 = arith.mulf %134, %133 : vector<16x64xf32>
    %136 = arith.addf %131, %135 : vector<16x64xf32>
    %cst_76 = arith.constant 0.797884583 : f32
    %137 = vector.broadcast %cst_76 : f32 to vector<16x64xf32>
    %138 = arith.mulf %137, %136 : vector<16x64xf32>
    %139 = math.tanh %138 : vector<16x64xf32>
    %cst_77 = arith.constant 1.000000e+00 : f32
    %140 = vector.broadcast %cst_77 : f32 to vector<16x64xf32>
    %141 = arith.addf %140, %139 : vector<16x64xf32>
    %cst_78 = arith.constant 5.000000e-01 : f32
    %142 = vector.broadcast %cst_78 : f32 to vector<16x64xf32>
    %143 = arith.mulf %142, %141 : vector<16x64xf32>
    %144 = arith.mulf %131, %143 : vector<16x64xf32>
    %145 = arith.addf %115, %144 : vector<16x64xf32>
    %146 = arith.truncf %145 : vector<16x64xf32> to vector<16x64xbf16>
    %cst_79 = arith.constant dense<0.000000e+00> : vector<16x64xf32>
    %147 = tpu.matmul %116, %146, %cst_79 {dimension_numbers = #tpu.dot_dimension_numbers<[1], [0], [0], [1], [0, 0, 1, 1], [], []>} : vector<16x16xbf16>, vector<16x64xbf16>, vector<16x64xf32> -> vector<16x64xf32>
    %c1 = arith.constant 1 : index
    %c0_80 = arith.constant 0 : index
    %c0_81 = arith.constant 0 : index
    %148 = vector.load %arg23[%c1, %c0_80, %c0_81] : memref<3x64x64xbf16, #tpu.memory_space<vmem>>, vector<1x64x64xbf16>
    %149 = vector.shape_cast %148 : vector<1x64x64xbf16> to vector<64x64xbf16>
    %150 = arith.truncf %147 : vector<16x64xf32> to vector<16x64xbf16>
    %cst_82 = arith.constant dense<0.000000e+00> : vector<16x64xf32>
    %151 = tpu.matmul %150, %149, %cst_82 {dimension_numbers = #tpu.dot_dimension_numbers<[1], [0], [0], [1], [0, 0, 1, 1], [], []>} : vector<16x64xbf16>, vector<64x64xbf16>, vector<16x64xf32> -> vector<16x64xf32>
    %c1_83 = arith.constant 1 : index
    %c0_84 = arith.constant 0 : index
    %c0_85 = arith.constant 0 : index
    %152 = vector.load %arg24[%c1_83, %c0_84, %c0_85] : memref<3x64x64xbf16, #tpu.memory_space<vmem>>, vector<1x64x64xbf16>
    %153 = vector.shape_cast %152 : vector<1x64x64xbf16> to vector<64x64xbf16>
    %154 = arith.truncf %145 : vector<16x64xf32> to vector<16x64xbf16>
    %cst_86 = arith.constant dense<0.000000e+00> : vector<16x64xf32>
    %155 = tpu.matmul %154, %153, %cst_86 {dimension_numbers = #tpu.dot_dimension_numbers<[1], [0], [0], [1], [0, 0, 1, 1], [], []>} : vector<16x64xbf16>, vector<64x64xbf16>, vector<16x64xf32> -> vector<16x64xf32>
    %156 = arith.addf %151, %155 : vector<16x64xf32>
    %c1_87 = arith.constant 1 : index
    %c0_88 = arith.constant 0 : index
    %c0_89 = arith.constant 0 : index
    %157 = vector.load %arg25[%c1_87, %c0_88, %c0_89] : memref<3x1x64xf32, #tpu.memory_space<vmem>>, vector<1x1x64xf32>
    %158 = vector.shape_cast %157 : vector<1x1x64xf32> to vector<1x64xf32>
    %159 = vector.broadcast %158 : vector<1x64xf32> to vector<16x64xf32>
    %160 = arith.addf %156, %159 : vector<16x64xf32>
    %161 = arith.mulf %160, %160 : vector<16x64xf32>
    %162 = arith.mulf %160, %161 : vector<16x64xf32>
    %cst_90 = arith.constant 4.471500e-02 : f32
    %163 = vector.broadcast %cst_90 : f32 to vector<16x64xf32>
    %164 = arith.mulf %163, %162 : vector<16x64xf32>
    %165 = arith.addf %160, %164 : vector<16x64xf32>
    %cst_91 = arith.constant 0.797884583 : f32
    %166 = vector.broadcast %cst_91 : f32 to vector<16x64xf32>
    %167 = arith.mulf %166, %165 : vector<16x64xf32>
    %168 = math.tanh %167 : vector<16x64xf32>
    %cst_92 = arith.constant 1.000000e+00 : f32
    %169 = vector.broadcast %cst_92 : f32 to vector<16x64xf32>
    %170 = arith.addf %169, %168 : vector<16x64xf32>
    %cst_93 = arith.constant 5.000000e-01 : f32
    %171 = vector.broadcast %cst_93 : f32 to vector<16x64xf32>
    %172 = arith.mulf %171, %170 : vector<16x64xf32>
    %173 = arith.mulf %160, %172 : vector<16x64xf32>
    %174 = arith.addf %145, %173 : vector<16x64xf32>
    %175 = arith.truncf %174 : vector<16x64xf32> to vector<16x64xbf16>
    %cst_94 = arith.constant dense<0.000000e+00> : vector<16x64xf32>
    %176 = tpu.matmul %116, %175, %cst_94 {dimension_numbers = #tpu.dot_dimension_numbers<[1], [0], [0], [1], [0, 0, 1, 1], [], []>} : vector<16x16xbf16>, vector<16x64xbf16>, vector<16x64xf32> -> vector<16x64xf32>
    %c2 = arith.constant 2 : index
    %c0_95 = arith.constant 0 : index
    %c0_96 = arith.constant 0 : index
    %177 = vector.load %arg23[%c2, %c0_95, %c0_96] : memref<3x64x64xbf16, #tpu.memory_space<vmem>>, vector<1x64x64xbf16>
    %178 = vector.shape_cast %177 : vector<1x64x64xbf16> to vector<64x64xbf16>
    %179 = arith.truncf %176 : vector<16x64xf32> to vector<16x64xbf16>
    %cst_97 = arith.constant dense<0.000000e+00> : vector<16x64xf32>
    %180 = tpu.matmul %179, %178, %cst_97 {dimension_numbers = #tpu.dot_dimension_numbers<[1], [0], [0], [1], [0, 0, 1, 1], [], []>} : vector<16x64xbf16>, vector<64x64xbf16>, vector<16x64xf32> -> vector<16x64xf32>
    %c2_98 = arith.constant 2 : index
    %c0_99 = arith.constant 0 : index
    %c0_100 = arith.constant 0 : index
    %181 = vector.load %arg24[%c2_98, %c0_99, %c0_100] : memref<3x64x64xbf16, #tpu.memory_space<vmem>>, vector<1x64x64xbf16>
    %182 = vector.shape_cast %181 : vector<1x64x64xbf16> to vector<64x64xbf16>
    %183 = arith.truncf %174 : vector<16x64xf32> to vector<16x64xbf16>
    %cst_101 = arith.constant dense<0.000000e+00> : vector<16x64xf32>
    %184 = tpu.matmul %183, %182, %cst_101 {dimension_numbers = #tpu.dot_dimension_numbers<[1], [0], [0], [1], [0, 0, 1, 1], [], []>} : vector<16x64xbf16>, vector<64x64xbf16>, vector<16x64xf32> -> vector<16x64xf32>
    %185 = arith.addf %180, %184 : vector<16x64xf32>
    %c2_102 = arith.constant 2 : index
    %c0_103 = arith.constant 0 : index
    %c0_104 = arith.constant 0 : index
    %186 = vector.load %arg25[%c2_102, %c0_103, %c0_104] : memref<3x1x64xf32, #tpu.memory_space<vmem>>, vector<1x1x64xf32>
    %187 = vector.shape_cast %186 : vector<1x1x64xf32> to vector<1x64xf32>
    %188 = vector.broadcast %187 : vector<1x64xf32> to vector<16x64xf32>
    %189 = arith.addf %185, %188 : vector<16x64xf32>
    %190 = arith.mulf %189, %189 : vector<16x64xf32>
    %191 = arith.mulf %189, %190 : vector<16x64xf32>
    %cst_105 = arith.constant 4.471500e-02 : f32
    %192 = vector.broadcast %cst_105 : f32 to vector<16x64xf32>
    %193 = arith.mulf %192, %191 : vector<16x64xf32>
    %194 = arith.addf %189, %193 : vector<16x64xf32>
    %cst_106 = arith.constant 0.797884583 : f32
    %195 = vector.broadcast %cst_106 : f32 to vector<16x64xf32>
    %196 = arith.mulf %195, %194 : vector<16x64xf32>
    %197 = math.tanh %196 : vector<16x64xf32>
    %cst_107 = arith.constant 1.000000e+00 : f32
    %198 = vector.broadcast %cst_107 : f32 to vector<16x64xf32>
    %199 = arith.addf %198, %197 : vector<16x64xf32>
    %cst_108 = arith.constant 5.000000e-01 : f32
    %200 = vector.broadcast %cst_108 : f32 to vector<16x64xf32>
    %201 = arith.mulf %200, %199 : vector<16x64xf32>
    %202 = arith.mulf %189, %201 : vector<16x64xf32>
    %203 = arith.addf %174, %202 : vector<16x64xf32>
    %c0_109 = arith.constant 0 : index
    %c0_110 = arith.constant 0 : index
    %204 = vector.load %arg34[%c0_109, %c0_110] : memref<16x64xf32, #tpu.memory_space<vmem>>, vector<16x64xf32>
    tpu.vector_store %arg34[%c0_109, %c0_110], %203 {strides = array<i32>} : memref<16x64xf32, #tpu.memory_space<vmem>>, vector<16x64xf32>,
    %c0_111 = arith.constant 0 : index
    %c0_112 = arith.constant 0 : index
    %205 = vector.load %arg4[%c0_111, %c0_112] : memref<16x1xi32, #tpu.memory_space<vmem>>, vector<16x1xi32>
    %206 = tpu.iota {dimensions = array<i32: 1>} : vector<16x2xi32>
    %207 = vector.broadcast %205 : vector<16x1xi32> to vector<16x2xi32>
    %208 = arith.cmpi eq, %207, %206 : vector<16x2xi32>
    %209 = arith.extui %208 : vector<16x2xi1> to vector<16x2xi32>
    %210 = arith.sitofp %209 : vector<16x2xi32> to vector<16x2xf32>
    %211 = vector.extract_strided_slice %210 {offsets = [0, 0], sizes = [16, 1], strides = [1, 1]} : vector<16x2xf32> to vector<16x1xf32>
    %cst_113 = arith.constant 0.000000e+00 : f32
    %212 = vector.broadcast %cst_113 : f32 to vector<16x1xf32>
    %213 = arith.cmpf ogt, %211, %212 : vector<16x1xf32>
    %cst_114 = arith.constant -3.000000e+38 : f32
    %214 = vector.shape_cast %213 : vector<16x1xi1> to vector<16x1xi1>
    %215 = vector.broadcast %214 : vector<16x1xi1> to vector<16x64xi1>
    %216 = vector.broadcast %cst_114 : f32 to vector<16x64xf32>
    %217 = arith.select %215, %203, %216 : vector<16x64xi1>, vector<16x64xf32>
    %cst_115 = arith.constant dense<0xFF800000> : vector<64xf32>
    %218 = vector.multi_reduction <maximumf>, %217, %cst_115 [0] : vector<16x64xf32> to vector<64xf32>
    %219 = vector.shape_cast %218 : vector<64xf32> to vector<1x64xf32>
    %220 = vector.extract_strided_slice %210 {offsets = [0, 1], sizes = [16, 1], strides = [1, 1]} : vector<16x2xf32> to vector<16x1xf32>
    %cst_116 = arith.constant 0.000000e+00 : f32
    %221 = vector.broadcast %cst_116 : f32 to vector<16x1xf32>
    %222 = arith.cmpf ogt, %220, %221 : vector<16x1xf32>
    %cst_117 = arith.constant -3.000000e+38 : f32
    %223 = vector.shape_cast %222 : vector<16x1xi1> to vector<16x1xi1>
    %224 = vector.broadcast %223 : vector<16x1xi1> to vector<16x64xi1>
    %225 = vector.broadcast %cst_117 : f32 to vector<16x64xf32>
    %226 = arith.select %224, %203, %225 : vector<16x64xi1>, vector<16x64xf32>
    %cst_118 = arith.constant dense<0xFF800000> : vector<64xf32>
    %227 = vector.multi_reduction <maximumf>, %226, %cst_118 [0] : vector<16x64xf32> to vector<64xf32>
    %228 = vector.shape_cast %227 : vector<64xf32> to vector<1x64xf32>
    %229 = tpu.concatenate %219, %228 in 0 : vector<1x64xf32>, vector<1x64xf32> -> vector<2x64xf32>
    %c0_119 = arith.constant 0 : index
    %c0_120 = arith.constant 0 : index
    %230 = vector.load %arg5[%c0_119, %c0_120] : memref<8x1xi32, #tpu.memory_space<vmem>>, vector<8x1xi32>
    %231 = tpu.iota {dimensions = array<i32: 1>} : vector<8x16xi32>
    %232 = vector.broadcast %230 : vector<8x1xi32> to vector<8x16xi32>
    %233 = arith.cmpi eq, %232, %231 : vector<8x16xi32>
    %234 = arith.extui %233 : vector<8x16xi1> to vector<8x16xi32>
    %235 = arith.sitofp %234 : vector<8x16xi32> to vector<8x16xf32>
    %c0_121 = arith.constant 0 : index
    %c0_122 = arith.constant 0 : index
    %236 = vector.load %arg6[%c0_121, %c0_122] : memref<8x1xi32, #tpu.memory_space<vmem>>, vector<8x1xi32>
    %237 = tpu.iota {dimensions = array<i32: 1>} : vector<8x16xi32>
    %238 = vector.broadcast %236 : vector<8x1xi32> to vector<8x16xi32>
    %239 = arith.cmpi eq, %238, %237 : vector<8x16xi32>
    %240 = arith.extui %239 : vector<8x16xi1> to vector<8x16xi32>
    %241 = arith.sitofp %240 : vector<8x16xi32> to vector<8x16xf32>
    %cst_123 = arith.constant dense<0.000000e+00> : vector<8x64xf32>
    %242 = tpu.matmul %235, %203, %cst_123 {dimension_numbers = #tpu.dot_dimension_numbers<[1], [0], [0], [1], [0, 0, 1, 1], [], []>} : vector<8x16xf32>, vector<16x64xf32>, vector<8x64xf32> -> vector<8x64xf32>
    %cst_124 = arith.constant dense<0.000000e+00> : vector<8x64xf32>
    %243 = tpu.matmul %241, %203, %cst_124 {dimension_numbers = #tpu.dot_dimension_numbers<[1], [0], [0], [1], [0, 0, 1, 1], [], []>} : vector<8x16xf32>, vector<16x64xf32>, vector<8x64xf32> -> vector<8x64xf32>
    %cst_125 = arith.constant dense<0.000000e+00> : vector<8x2xf32>
    %244 = tpu.matmul %235, %210, %cst_125 {dimension_numbers = #tpu.dot_dimension_numbers<[1], [0], [0], [1], [0, 0, 1, 1], [], []>} : vector<8x16xf32>, vector<16x2xf32>, vector<8x2xf32> -> vector<8x2xf32>
    %cst_126 = arith.constant dense<0.000000e+00> : vector<8x64xf32>
    %245 = tpu.matmul %244, %229, %cst_126 {dimension_numbers = #tpu.dot_dimension_numbers<[1], [0], [0], [1], [0, 0, 1, 1], [], []>} : vector<8x2xf32>, vector<2x64xf32>, vector<8x64xf32> -> vector<8x64xf32>
    %c0_127 = arith.constant 0 : index
    %c0_128 = arith.constant 0 : index
    %246 = vector.load %arg35[%c0_127, %c0_128] : memref<8x64xf32, #tpu.memory_space<vmem>>, vector<8x64xf32>
    tpu.vector_store %arg35[%c0_127, %c0_128], %242 {strides = array<i32>} : memref<8x64xf32, #tpu.memory_space<vmem>>, vector<8x64xf32>,
    %c0_129 = arith.constant 0 : index
    %c0_130 = arith.constant 0 : index
    %247 = vector.load %arg36[%c0_129, %c0_130] : memref<8x64xf32, #tpu.memory_space<vmem>>, vector<8x64xf32>
    tpu.vector_store %arg36[%c0_129, %c0_130], %243 {strides = array<i32>} : memref<8x64xf32, #tpu.memory_space<vmem>>, vector<8x64xf32>,
    %c0_131 = arith.constant 0 : index
    %c0_132 = arith.constant 0 : index
    %248 = vector.load %arg37[%c0_131, %c0_132] : memref<8x64xf32, #tpu.memory_space<vmem>>, vector<8x64xf32>
    tpu.vector_store %arg37[%c0_131, %c0_132], %245 {strides = array<i32>} : memref<8x64xf32, #tpu.memory_space<vmem>>, vector<8x64xf32>,
    %249 = tpu.concatenate %242, %243 in 0 : vector<8x64xf32>, vector<8x64xf32> -> vector<16x64xf32>
    %250 = tpu.concatenate %243, %242 in 0 : vector<8x64xf32>, vector<8x64xf32> -> vector<16x64xf32>
    %251 = tpu.concatenate %245, %245 in 0 : vector<8x64xf32>, vector<8x64xf32> -> vector<16x64xf32>
    %c0_133 = arith.constant 0 : index
    %c0_134 = arith.constant 0 : index
    %c0_135 = arith.constant 0 : index
    %252 = vector.load %arg26[%c0_133, %c0_134, %c0_135] : memref<3x64x128xbf16, #tpu.memory_space<vmem>>, vector<1x64x128xbf16>
    %253 = vector.shape_cast %252 : vector<1x64x128xbf16> to vector<64x128xbf16>
    %254 = arith.truncf %249 : vector<16x64xf32> to vector<16x64xbf16>
    %cst_136 = arith.constant dense<0.000000e+00> : vector<16x128xf32>
    %255 = tpu.matmul %254, %253, %cst_136 {dimension_numbers = #tpu.dot_dimension_numbers<[1], [0], [0], [1], [0, 0, 1, 1], [], []>} : vector<16x64xbf16>, vector<64x128xbf16>, vector<16x128xf32> -> vector<16x128xf32>
    %c1_137 = arith.constant 1 : index
    %c0_138 = arith.constant 0 : index
    %c0_139 = arith.constant 0 : index
    %256 = vector.load %arg26[%c1_137, %c0_138, %c0_139] : memref<3x64x128xbf16, #tpu.memory_space<vmem>>, vector<1x64x128xbf16>
    %257 = vector.shape_cast %256 : vector<1x64x128xbf16> to vector<64x128xbf16>
    %258 = arith.truncf %250 : vector<16x64xf32> to vector<16x64xbf16>
    %cst_140 = arith.constant dense<0.000000e+00> : vector<16x128xf32>
    %259 = tpu.matmul %258, %257, %cst_140 {dimension_numbers = #tpu.dot_dimension_numbers<[1], [0], [0], [1], [0, 0, 1, 1], [], []>} : vector<16x64xbf16>, vector<64x128xbf16>, vector<16x128xf32> -> vector<16x128xf32>
    %260 = arith.addf %255, %259 : vector<16x128xf32>
    %c2_141 = arith.constant 2 : index
    %c0_142 = arith.constant 0 : index
    %c0_143 = arith.constant 0 : index
    %261 = vector.load %arg26[%c2_141, %c0_142, %c0_143] : memref<3x64x128xbf16, #tpu.memory_space<vmem>>, vector<1x64x128xbf16>
    %262 = vector.shape_cast %261 : vector<1x64x128xbf16> to vector<64x128xbf16>
    %263 = arith.truncf %251 : vector<16x64xf32> to vector<16x64xbf16>
    %cst_144 = arith.constant dense<0.000000e+00> : vector<16x128xf32>
    %264 = tpu.matmul %263, %262, %cst_144 {dimension_numbers = #tpu.dot_dimension_numbers<[1], [0], [0], [1], [0, 0, 1, 1], [], []>} : vector<16x64xbf16>, vector<64x128xbf16>, vector<16x128xf32> -> vector<16x128xf32>
    %265 = arith.addf %260, %264 : vector<16x128xf32>
    %c0_145 = arith.constant 0 : index
    %c0_146 = arith.constant 0 : index
    %266 = vector.load %arg27[%c0_145, %c0_146] : memref<1x128xf32, #tpu.memory_space<vmem>>, vector<1x128xf32>
    %267 = vector.broadcast %266 : vector<1x128xf32> to vector<16x128xf32>
    %268 = arith.addf %265, %267 : vector<16x128xf32>
    %cst_147 = arith.constant 0.000000e+00 : f32
    %269 = vector.broadcast %cst_147 : f32 to vector<16x128xf32>
    %270 = arith.maximumf %268, %269 : vector<16x128xf32>
    %c0_148 = arith.constant 0 : index
    %c0_149 = arith.constant 0 : index
    %271 = vector.load %arg28[%c0_148, %c0_149] : memref<128x128xbf16, #tpu.memory_space<vmem>>, vector<128x128xbf16>
    %272 = arith.truncf %270 : vector<16x128xf32> to vector<16x128xbf16>
    %cst_150 = arith.constant dense<0.000000e+00> : vector<16x128xf32>
    %273 = tpu.matmul %272, %271, %cst_150 {dimension_numbers = #tpu.dot_dimension_numbers<[1], [0], [0], [1], [0, 0, 1, 1], [], []>} : vector<16x128xbf16>, vector<128x128xbf16>, vector<16x128xf32> -> vector<16x128xf32>
    %c0_151 = arith.constant 0 : index
    %c0_152 = arith.constant 0 : index
    %274 = vector.load %arg29[%c0_151, %c0_152] : memref<1x128xf32, #tpu.memory_space<vmem>>, vector<1x128xf32>
    %275 = vector.broadcast %274 : vector<1x128xf32> to vector<16x128xf32>
    %276 = arith.addf %273, %275 : vector<16x128xf32>
    %cst_153 = arith.constant 0.000000e+00 : f32
    %277 = vector.broadcast %cst_153 : f32 to vector<16x128xf32>
    %278 = arith.maximumf %276, %277 : vector<16x128xf32>
    %c0_154 = arith.constant 0 : index
    %c0_155 = arith.constant 0 : index
    %279 = vector.load %arg30[%c0_154, %c0_155] : memref<128x128xbf16, #tpu.memory_space<vmem>>, vector<128x128xbf16>
    %280 = arith.truncf %278 : vector<16x128xf32> to vector<16x128xbf16>
    %cst_156 = arith.constant dense<0.000000e+00> : vector<16x128xf32>
    %281 = tpu.matmul %280, %279, %cst_156 {dimension_numbers = #tpu.dot_dimension_numbers<[1], [0], [0], [1], [0, 0, 1, 1], [], []>} : vector<16x128xbf16>, vector<128x128xbf16>, vector<16x128xf32> -> vector<16x128xf32>
    %c0_157 = arith.constant 0 : index
    %c0_158 = arith.constant 0 : index
    %282 = vector.load %arg31[%c0_157, %c0_158] : memref<1x128xf32, #tpu.memory_space<vmem>>, vector<1x128xf32>
    %283 = vector.broadcast %282 : vector<1x128xf32> to vector<16x128xf32>
    %284 = arith.addf %281, %283 : vector<16x128xf32>
    %cst_159 = arith.constant 0.000000e+00 : f32
    %285 = vector.broadcast %cst_159 : f32 to vector<16x128xf32>
    %286 = arith.maximumf %284, %285 : vector<16x128xf32>
    %c0_160 = arith.constant 0 : index
    %c0_161 = arith.constant 0 : index
    %287 = vector.load %arg32[%c0_160, %c0_161] : memref<128x1xbf16, #tpu.memory_space<vmem>>, vector<128x1xbf16>
    %288 = arith.truncf %286 : vector<16x128xf32> to vector<16x128xbf16>
    %cst_162 = arith.constant dense<0.000000e+00> : vector<16x1xf32>
    %289 = tpu.matmul %288, %287, %cst_162 {dimension_numbers = #tpu.dot_dimension_numbers<[1], [0], [0], [1], [0, 0, 1, 1], [], []>} : vector<16x128xbf16>, vector<128x1xbf16>, vector<16x1xf32> -> vector<16x1xf32>
    %c0_163 = arith.constant 0 : index
    %c0_164 = arith.constant 0 : index
    %290 = vector.load %arg33[%c0_163, %c0_164] : memref<1x1xf32, #tpu.memory_space<vmem>>, vector<1x1xf32>
    %291 = vector.broadcast %290 : vector<1x1xf32> to vector<16x1xf32>
    %292 = arith.addf %289, %291 : vector<16x1xf32>
    %c0_165 = arith.constant 0 : index
    %c0_166 = arith.constant 0 : index
    %293 = vector.load %arg38[%c0_165, %c0_166] : memref<16x1xf32, #tpu.memory_space<vmem>>, vector<16x1xf32>
    tpu.vector_store %arg38[%c0_165, %c0_166], %292 {strides = array<i32>} : memref<16x1xf32, #tpu.memory_space<vmem>>, vector<16x1xf32>,
    return
  }
}

</mosaic_0001>

<bundles_post_ra>
// kernel: gcn_forward.1
= control target key start
LH: loop header
LB: loop body
LE: loop exit
PB: predicated region body
PF: predicated region fallthrough
CT: control target
= control target key end

     0   :  { %s3605_s6 = smov 1   ;;  %s3606_s10 = smov 2   ;;  %s4264_s0 = inlined_call_operand.smem [shape: u32[39], index: -1, kind: input, shape index: {}] }
   0x1   :  { %s3659_s5 = sld [smem:[%s4264_s0]]   ;;  %s3607_s14 = smov 3  }
   0x2   :  { %s3664_s9 = sld [smem:[%s4264_s0 + %s3605_s6]]   ;;  %s3608_s18 = smov 4  }
   0x3   :  { %s3669_s13 = sld [smem:[%s4264_s0 + %s3606_s10]]   ;;  %s3609_s22 = smov 5  }
   0x4   :  { %s3674_s17 = sld [smem:[%s4264_s0 + %s3607_s14]]   ;;  %s3610_s26 = smov 6  }
   0x5   :  { %s3679_s21 = sld [smem:[%s4264_s0 + %s3608_s18]]   ;;  %s3611_s30 = smov 7  }
   0x6   :  { %s3684_s25 = sld [smem:[%s4264_s0 + %s3609_s22]]   ;;  %s3612_s4 = smov 8  }
   0x7   :  { %s3689_s29 = sld [smem:[%s4264_s0 + %s3610_s26]]   ;;  %s3613_s10 = smov 9  }
   0x8   :  { %s3694_s3 = sld [smem:[%s4264_s0 + %s3611_s30]]   ;;  %s3614_s15 = smov 10  }
   0x9   :  { %s3699_s8 = sld [smem:[%s4264_s0 + %s3612_s4]]   ;;  %s3615_s20 = smov 11  }
   0xa   :  { %4273 = sst [smem:[#allocation6_spill]] %s3674_s17  ;;  %s3616_s26 = smov 12  }
   0xb   :  { %4274 = sst [smem:[#allocation7_spill]] %s3679_s21  ;;  %s3617_s1 = smov 13  }
   0xc   :  { %4275 = sst [smem:[#allocation8_spill]] %s3684_s25  ;;  %s3618_s7 = smov 14  }
   0xd   :  { %4276 = sst [smem:[#allocation9_spill]] %s3689_s29  ;;  %s3620_s22 = smov 16  }
   0xe   :  { %s3704_s14 = sld [smem:[%s4264_s0 + %s3613_s10]]   ;;  %s3621_s28 = smov 17  }
   0xf   :  { %s3709_s19 = sld [smem:[%s4264_s0 + %s3614_s15]]   ;;  %s3619_s15 = smov 15  }
  0x10   :  { %s3714_s24 = sld [smem:[%s4264_s0 + %s3615_s20]]   ;;  %s3638_s10 = smov 34  }
  0x11   :  { %s3719_s30 = sld [smem:[%s4264_s0 + %s3616_s26]]   ;;  %s3639_s16 = smov 35  }
  0x12   :  { %s3724_s6 = sld [smem:[%s4264_s0 + %s3617_s1]]   ;;  %s3640_s23 = smov 36  }
  0x13   :  { %s3729_s12 = sld [smem:[%s4264_s0 + %s3618_s7]]   ;;  %s3622_s7 = smov 18  }
  0x14   :  { %s3734_s20 = sld [smem:[%s4264_s0 + %s3619_s15]]   ;;  %s3623_s15 = smov 19  }
  0x15   :  { %s3739_s27 = sld [smem:[%s4264_s0 + %s3620_s22]]   ;;  %s3624_s22 = smov 20  }
  0x16   :  { %s3744_s4 = sld [smem:[%s4264_s0 + %s3621_s28]]   ;;  %s3625_s28 = smov 21  }
  0x17   :  { %s3749_s29 = sld [smem:[%s4264_s0 + %s3622_s7]]   ;;  %s3626_s7 = smov 22  }
  0x18   :  { %s3754_s17 = sld [smem:[%s4264_s0 + %s3623_s15]]   ;;  %s3627_s15 = smov 23  }
  0x19   :  { %s3759_s25 = sld [smem:[%s4264_s0 + %s3624_s22]]   ;;  %s3628_s22 = smov 24  }
  0x1a   :  { %4277 = sst [smem:[#allocation10_spill]] %s3734_s20  ;;  %s3641_s1 = smov 37  }
  0x1b   :  { %4278 = sst [smem:[#allocation11_spill]] %s3739_s27 }
  0x1c   :  { %s3764_s21 = sld [smem:[%s4264_s0 + %s3625_s28]]   ;;  %s3629_s28 = smov 25  }
  0x1d   :  { %4279 = sst [smem:[#allocation12_spill]] %s3749_s29 }
  0x1e   :  { %s3769_s29 = sld [smem:[%s4264_s0 + %s3626_s7]]   ;;  %s3630_s7 = smov 26  }
  0x1f   :  { %4280 = sst [smem:[#allocation13_spill]] %s3759_s25 }
  0x20   :  { %s3774_s27 = sld [smem:[%s4264_s0 + %s3627_s15]]   ;;  %s3631_s15 = smov 27  }
  0x21   :  { %s3779_s25 = sld [smem:[%s4264_s0 + %s3628_s22]]   ;;  %s3632_s22 = smov 28  }
  0x22   :  { %4281 = sst [smem:[#allocation14_spill]] %s3764_s21 }
  0x23   :  { %s3784_s21 = sld [smem:[%s4264_s0 + %s3629_s28]]   ;;  %s3633_s28 = smov 29  }
  0x24   :  { %4282 = sst [smem:[#allocation15_spill]] %s3769_s29 }
  0x25   :  { %s3789_s29 = sld [smem:[%s4264_s0 + %s3630_s7]]   ;;  %s3634_s7 = smov 30  }
  0x26   :  { %4283 = sst [smem:[#allocation16_spill]] %s3774_s27 }
  0x27   :  { %4284 = sst [smem:[#allocation17_spill]] %s3779_s25 }
  0x28   :  { %s3794_s27 = sld [smem:[%s4264_s0 + %s3631_s15]]   ;;  %s3635_s15 = smov 31  }
  0x29   :  { %4285 = sst [smem:[#allocation18_spill]] %s3784_s21 }
  0x2a   :  { %s3799_s25 = sld [smem:[%s4264_s0 + %s3632_s22]]   ;;  %s3636_s22 = smov 32  }
  0x2b   :  { %4286 = sst [smem:[#allocation19_spill]] %s3789_s29 }
  0x2c   :  { %s3804_s21 = sld [smem:[%s4264_s0 + %s3633_s28]]   ;;  %s3637_s28 = smov 33  }
  0x2d   :  { %s3809_s29 = sld [smem:[%s4264_s0 + %s3634_s7]]  }
  0x2e   :  { %4287 = sst [smem:[#allocation20_spill]] %s3794_s27 }
  0x2f   :  { %s3814_s27 = sld [smem:[%s4264_s0 + %s3635_s15]]  }
  0x30   :  { %4288 = sst [smem:[#allocation21_spill]] %s3799_s25 }
  0x31   :  { %s3819_s25 = sld [smem:[%s4264_s0 + %s3636_s22]]  }
  0x32   :  { %4289 = sst [smem:[#allocation22_spill]] %s3804_s21 }
  0x33   :  { %4290 = sst [smem:[#allocation23_spill]] %s3809_s29 }
  0x34   :  { %s2745_s21 = sld [smem:[%s4264_s0 + %s3637_s28]]  }
  0x35   :  { %4291 = sst [smem:[#allocation24_spill]] %s3814_s27 }
  0x36   :  { %s3827_s29 = sld [smem:[%s4264_s0 + %s3638_s10]]   ;;  %s3642_s10 = smov 38  }
  0x37   :  { %4292 = sst [smem:[#allocation25_spill]] %s3819_s25 }
  0x38   :  { %s3832_s27 = sld [smem:[%s4264_s0 + %s3639_s16]]  }
  0x39   :  { %s3837_s25 = sld [smem:[%s4264_s0 + %s3640_s23]]  }
  0x3a   :  { %s3842_s20 = sld [smem:[%s4264_s0 + %s3641_s1]]   ;;  %v83_v0 = vstv %s2745_s21 }
  0x3b   :  { %84 = vst [vmem:[#allocation2] sm:$0x1] %v83_v0 }
  0x3c   :  { %4293 = sst [smem:[#allocation26_spill]] %s3827_s29 }
  0x3d   :  { %s3847_s29 = sld [smem:[%s4264_s0 + %s3642_s10]]  }
  0x3e   :  { %v3457_v1 = vld [vmem:[%s3694_s3 + $0x38] sm:$0xff]   ;;  %v3643_v2 = vmov 0.0   ;;  %v3458_v3 = vld [vmem:[%s3694_s3 + $0x30] sm:$0xff]   ;;  %vm3644_vm0 = vmmov 0   ;;  %v3645_v4 = vmov 0   ;;  %v3459_v5 = vld [vmem:[%s3694_s3 + $0x28] sm:$0xff]  }
  0x3f   :  { %3081 = vmatprep.subr.bf16.mxu0 %v3643_v2  ;;  %3101 = vmatprep.subr.bf16.mxu1 %v3643_v2  ;;  %v275_v6 = vld [vmem:[%s3664_s9] sm:$0xff]  ;;  %v3466_v8 = vld [vmem:[%s3709_s19 + $0x18] sm:$0xff]   ;;  %v276_v9 = vld [vmem:[%s3664_s9 + $0x8] sm:$0xff] }
  0x40   :  { %3082 = vmatpush3.bf16.msra.mxu0 %v3457_v1  ;;  %3097 = vmatprep.mubr.msk.bf16.mxu0 %vm3644_vm0, %v3643_v2  ;;  %v3460_v7 = vld [vmem:[%s3694_s3 + $0x20] sm:$0xff]   ;;  %v3468_v10 = vld [vmem:[%s3709_s19 + $0x10] sm:$0xff]   ;;  %v3461_v11 = vld [vmem:[%s3694_s3 + $0x18] sm:$0xff]  }
  0x41   :  { %3083 = vmatprep.subr.bf16.mxu0 %v3643_v2  ;;  %3451 = vset.pattern.permute.xlu0 %v3645_v4  ;;  %v3462_v12 = vld [vmem:[%s3694_s3 + $0x10] sm:$0xff]   ;;  %v3463_v13 = vld [vmem:[%s3694_s3 + $0x8] sm:$0xff]   ;;  %v3464_v14 = vld [vmem:[%s3694_s3] sm:$0xff]  }
  0x42   :  { %3109 = vmatprep.mubr.msk.bf16.mxu1 %vm3644_vm0, %v3643_v2  ;;  %3452 = vset.pattern.permute.xlu1 %v3645_v4  ;;  %v3465_v15 = vld [vmem:[%s3659_s5] sm:$0xff]   ;;  %v3467_v16 = vld [vmem:[%s3719_s30 + $0x18] sm:$0xff]  }
  0x43   :  { %280 = vperm.xlu0 %3451, %v275_v6   ;;  %3102 = vmatpush3.bf16.msra.mxu1 %v3466_v8 }
  0x44   :  { %3084 = vmatpush3.bf16.msra.mxu0 %v3458_v3  ;;  %3103 = vmatprep.subr.bf16.mxu1 %v3643_v2 }
  0x45   :  { %3085 = vmatprep.subr.bf16.mxu0 %v3643_v2 }
  0x47   :  { %285 = vperm.xlu0 %3451, %v276_v9   ;;  %3104 = vmatpush3.bf16.msra.mxu1 %v3468_v10 }
  0x48   :  { %3086 = vmatpush3.bf16.msra.mxu0 %v3459_v5  ;;  %3105 = vmatprep.subr.bf16.mxu1 %v3643_v2 }
  0x49   :  { %3087 = vmatprep.subr.bf16.mxu0 %v3643_v2 }
  0x4c   :  { %3088 = vmatpush3.bf16.msra.mxu0 %v3460_v7 }
  0x4d   :  { %3089 = vmatprep.subr.bf16.mxu0 %v3643_v2 }
  0x50   :  { %3090 = vmatpush3.bf16.msra.mxu0 %v3461_v11 }
  0x51   :  { %3091 = vmatprep.subr.bf16.mxu0 %v3643_v2 }
  0x54   :  { %3092 = vmatpush3.bf16.msra.mxu0 %v3462_v12 }
  0x55   :  { %3093 = vmatprep.subr.bf16.mxu0 %v3643_v2 }
  0x58   :  { %3094 = vmatpush3.bf16.msra.mxu0 %v3463_v13 }
  0x59   :  { %3095 = vmatprep.subr.bf16.mxu0 %v3643_v2 }
  0x5c   :  { %3096 = vmatpush3.bf16.msra.mxu0 %v3464_v14 }
  0x5d   :  { %3125 = vmatprep.subr.bf16.mxu0 %v3643_v2 }
  0x5f   :  { %3098 = vmatmul.mubr.bf16.vlgmr.msra.gmra.mxu0 %v3465_v15 }
  0x60   :  { %3126 = vmatpush3.bf16.msra.mxu0 %v3467_v16  ;;  %3133 = vmatprep.mubr.msk.bf16.mxu0 %vm3644_vm0, %v3643_v2 }
  0x61   :  { %3127 = vmatprep.subr.bf16.mxu0 %v3643_v2 }
  0x62   :  { %85 = vsyncpa [#allocation4], 0  ;;  %v3469_v17 = vld [vmem:[%s3719_s30 + $0x10] sm:$0xff]   ;;  %v3470_v18 = vld [vmem:[%s3709_s19 + $0x8] sm:$0xff]   ;;  %vm331_vm1 = vcmask 523264   ;;  %v576_v57 = vlaneseq  ;;  %vm583_vm4 = vcmask 130048  }
  0x63   :  { %v3471_v19 = vld [vmem:[%s3719_s30 + $0x8] sm:$0xff]   ;;  %3106 = vmatpush3.bf16.msra.mxu1 %v3470_v18  ;;  %v3472_v20 = vld [vmem:[%s3709_s19] sm:$0xff]   ;;  %v3474_v36 = vld [vmem:[%s3714_s24 + $0x18] sm:$0xff]   ;;  %s4294_s0 = sld [smem:[#allocation10_spill]]  ;;  %vm1776_vm15 = vcmask 1040384   ;;  %s3648_s18 = smov [#allocation3]  }
  0x64   :  { %3128 = vmatpush3.bf16.msra.mxu0 %v3469_v17  ;;  %3107 = vmatprep.subr.bf16.mxu1 %v3643_v2  ;;  %v3473_v21 = vld [vmem:[%s3719_s30] sm:$0xff]   ;;  %v3475_v38 = vld [vmem:[%s3714_s24 + $0x10] sm:$0xff]   ;;  %v3476_v39 = vld [vmem:[%s3714_s24 + $0x8] sm:$0xff]   ;;  %v577_v59 = vshrl.u32 %v576_v57, 7  ;;  %s4295_s5 = sld [smem:[#allocation11_spill]]  ;;  %s2686_s23 = sshll.u32 %s3648_s18, 4  ;;  %s2687_s23 = int_to_ptr.vmem [resolvable:$true] %s2686_s23 }
  0x65   :  { %3129 = vmatprep.subr.bf16.mxu0 %v3643_v2  ;;  %v2761_v23 = vld [vmem:[%s3704_s14] ss:$0 sm:$0xff]  ;;  %s4296_s9 = sld [smem:[#allocation12_spill]]  ;;  %s3583_s22 = scalar_lea.vmem %s2687_s23, 256 }
  0x66   :  { %v2751_v24 = vld [vmem:[%s3699_s8] ss:$0 sm:$0xff]  ;;  %v578_v60 = vsub.s32 0, %v577_v59  ;;  %v3482_v59 = vld [vmem:[%s3744_s4 + $0x18] sm:$0xff]   ;;  %s4299_s21 = sld [smem:[#allocation8_spill]]  ;;  %p3584_p0 = scmp.ne.s32.totalorder %s2687_s23, %s3583_s22 }
  0x67   :  { %3108 = vmatpush3.bf16.msra.mxu1 %v3472_v20  ;;  %v3477_v40 = vld [vmem:[%s3714_s24] sm:$0xff]   ;;  %s4300_s3 = sld [smem:[#allocation14_spill]]  ;;  %p3588_p1 = scmp.lt.s32.totalorder %s2687_s23, %s2687_s23 }
  0x68   :  { %3130 = vmatpush3.bf16.msra.mxu0 %v3471_v19  ;;  %3113 = vmatprep.subr.bf16.mxu1 %v3643_v2  ;;  %v573_v58 = vld [vmem:[%s3669_s13] sm:$0x1]  ;;  %s4297_s13 = sld [smem:[#allocation13_spill]]  ;;  %p3589_p2 = scmp.lt.s32.totalorder %s3583_s22, %s3583_s22 }
  0x69   :  { %3131 = vmatprep.subr.bf16.mxu0 %v3643_v2  ;;  %vm574_vm2 = vcmp.gt.f32.partialorder %v573_v58, 0.0  ;;  %s4301_s8 = sld [smem:[#allocation15_spill]] }
  0x6a   :  { %v575_v61 = vsel %vm574_vm2, 1, %v3645_v4  ;;  %s4302_s14 = sld [smem:[#allocation6_spill]]  ;;  %vm2012_vm2 = vcmask 1041408   ;;  %p3590_p3 = por %p3589_p2, %p3588_p1 }
  0x6b   :  { %v579_v62 = vrot.slane %v575_v61, %v578_v60  ;;  %v3483_v60 = vld [vmem:[%s3744_s4 + $0x10] sm:$0xff]   ;;  %v3484_v61 = vld [vmem:[%s3744_s4 + $0x8] sm:$0xff]   ;;  %s4303_s19 = sld [smem:[#allocation17_spill]] }
  0x6c   :  { %3132 = vmatpush3.bf16.msra.mxu0 %v3473_v21  ;;  %v3478_v21 = vld [vmem:[%s3724_s6 + $0x18] sm:$0xff]   ;;  %s4304_s24 = sld [smem:[#allocation16_spill]]  ;;  %p3591_p4 = pnand %p3590_p3, %p3584_p0 }
  0x6d   :  { %3137 = vmatprep.subr.bf16.mxu0 %v3643_v2  ;;  %vm580_vm3 = vcmp.eq.s32.totalorder %v579_v62, 1  ;;  %v3485_v62 = vld [vmem:[%s3744_s4] sm:$0xff]   ;;  %s4305_s30 = sld [smem:[#allocation18_spill]] }
  0x6e   :  { %s4308_s4 = sld [smem:[#allocation21_spill]] }
  0x6f   :  { %s4312_s16 = sld [smem:[#allocation22_spill]] }
  0x70   :  { %s4313_s15 = sld [smem:[#allocation24_spill]] }
  0xbe   :  { %v281_v22 = vpop.permute.xlu0 %280 }
  0xbf   :  { %v294_v28 = vmul.f32 %v2761_v23, %v281_v22  ;;  %v3479_v22 = vld [vmem:[%s3724_s6 + $0x10] sm:$0xff]  }
  0xc2   :  { %v286_v26 = vpop.permute.xlu0 %285 }
  0xc3   :  { %v295_v31 = vmul.f32 %v2761_v23, %v286_v26 }
 0x11f   :  { %v268_v25 = vpop.f32.mrf.mxu0 }
 0x120   :  { %v269_v29 = vadd.f32 %v2751_v24, %v268_v25 }
 0x121   :  { %v3099_v27 = vpop.f32.mrf.mxu0 }
 0x122   :  { %v3896_v34 = vadd.f32 %v294_v28, %v269_v29 }
 0x123   :  { %v271_v30 = vpop.f32.mrf.mxu0 }
 0x124   :  { %v272_v32 = vadd.f32 %v2751_v24, %v271_v30  ;;  %v3480_v30 = vld [vmem:[%s3724_s6 + $0x8] sm:$0xff]  }
 0x125   :  { %v3100_v33 = vpop.f32.mrf.mxu0 }
 0x126   :  { %v3898_v35 = vadd.f32 %v295_v31, %v272_v32  ;;  %v3481_v31 = vld [vmem:[%s3724_s6] sm:$0xff]   ;;  %s4306_s6 = sld [smem:[#allocation9_spill]] }
 0x128   :  { %v306_v37 = vpack.c.bf16 %v3898_v35, %v3896_v34 }
 0x12a   :  { %3110 = vmatmul.mubr.msk.bf16.vlgmr.msra.gmra.mxu1 %vm331_vm1, %v306_v37  ;;  %3134 = vmatmul.mubr.msk.bf16.vlgmr.msra.gmra.mxu0 %vm331_vm1, %v306_v37 }
 0x12b   :  { %3114 = vmatpush3.bf16.msra.mxu1 %v3474_v36  ;;  %3121 = vmatprep.mubr.msk.bf16.mxu1 %vm3644_vm0, %v3643_v2 }
 0x12c   :  { %3115 = vmatprep.subr.bf16.mxu1 %v3643_v2  ;;  %3139 = vmatprep.mubr.msk.bf16.mxu0 %vm3644_vm0, %v3643_v2 }
 0x12f   :  { %3116 = vmatpush3.bf16.msra.mxu1 %v3475_v38 }
 0x130   :  { %3117 = vmatprep.subr.bf16.mxu1 %v3643_v2 }
 0x133   :  { %3118 = vmatpush3.bf16.msra.mxu1 %v3476_v39  ;;  %v2779_v39 = vld [vmem:[%s3729_s12] ss:$0 sm:$0xff]  ;;  %s4307_s12 = sld [smem:[#allocation19_spill]] }
 0x134   :  { %3119 = vmatprep.subr.bf16.mxu1 %v3643_v2 }
 0x137   :  { %3120 = vmatpush3.bf16.msra.mxu1 %v3477_v40 }
 0x138   :  { %3143 = vmatprep.subr.bf16.mxu1 %v3643_v2 }
 0x13a   :  { %3122 = vmatmul.mubr.msk.bf16.vlgmr.msra.gmra.mxu1 %vm331_vm1, %v306_v37 }
 0x13b   :  { %3145 = vmatprep.mubr.msk.bf16.mxu1 %vm3644_vm0, %v3643_v2 }
 0x1ea   :  { %v369_v41 = vpop.f32.mrf.mxu1  ;;  %v515_v42 = vpop.f32.mrf.mxu0 }
 0x1ec   :  { %v3111_v43 = vpop.f32.mrf.mxu1  ;;  %v3135_v44 = vpop.f32.mrf.mxu0 }
 0x1ee   :  { %v372_v45 = vpop.f32.mrf.mxu1  ;;  %v518_v46 = vpop.f32.mrf.mxu0 }
 0x1ef   :  { %v607_v47 = vpack.c.bf16 %v518_v46, %v515_v42  ;;  %v522_v56 = vpack.c.bf16 %v372_v45, %v369_v41 }
 0x1f0   :  { %v3112_v48 = vpop.f32.mrf.mxu1  ;;  %v3136_v49 = vpop.f32.mrf.mxu0 }
 0x1f1   :  { %3144 = vmatpush3.bf16.msra.mxu1 %v607_v47 }
 0x1f2   :  { %3161 = vmatprep.subr.bf16.mxu1 %v3643_v2 }
 0x1fa   :  { %v442_v50 = vpop.f32.mrf.mxu1 }
 0x1fc   :  { %v3123_v51 = vpop.f32.mrf.mxu1 }
 0x1fe   :  { %v445_v52 = vpop.f32.mrf.mxu1 }
 0x1ff   :  { %v523_v53 = vpack.c.bf16 %v445_v52, %v442_v50 }
 0x200   :  { %v3124_v54 = vpop.f32.mrf.mxu1 }
 0x201   :  { %v528_v55 = vsel %vm331_vm1, %v523_v53, 0 }
 0x202   :  { %3138 = vmatpush3.bf16.xpose.msra.mxu0 %v528_v55 }
 0x203   :  { %3149 = vmatprep.subr.bf16.mxu0 %v3643_v2 }
 0x209   :  { %3140 = vmatmul.mubr.msk.bf16.vlgmr.msra.gmra.mxu0 %vm331_vm1, %v522_v56 }
 0x20a   :  { %3157 = vmatprep.mubr.msk.bf16.mxu0 %vm3644_vm0, %v3643_v2  ;;  %3150 = vmatpush3.bf16.msra.mxu0 %v3478_v21 }
 0x20b   :  { %3151 = vmatprep.subr.bf16.mxu0 %v3643_v2 }
 0x20e   :  { %3152 = vmatpush3.bf16.msra.mxu0 %v3479_v22 }
 0x20f   :  { %3153 = vmatprep.subr.bf16.mxu0 %v3643_v2 }
 0x212   :  { %3154 = vmatpush3.bf16.msra.mxu0 %v3480_v30 }
 0x213   :  { %3155 = vmatprep.subr.bf16.mxu0 %v3643_v2 }
 0x216   :  { %3156 = vmatpush3.bf16.msra.mxu0 %v3481_v31 }
 0x217   :  { %3173 = vmatprep.subr.bf16.mxu0 %v3643_v2 }
 0x2c9   :  { %v564_v63 = vpop.f32.mrf.mxu0 }
 0x2ca   :  { %v571_v0 = vmul.f32 0.125, %v564_v63  ;;  %v3486_v63 = vld [vmem:[%s3754_s17 + $0x38] sm:$0xff]  }
 0x2cb   :  { %v3141_v1 = vpop.f32.mrf.mxu0 }
 0x2cc   :  { %v581_v3 = vsel %vm580_vm3, %v571_v0, -1e+30  ;;  %v3487_v0 = vld [vmem:[%s3754_s17 + $0x30] sm:$0xff]   ;;  %v3488_v1 = vld [vmem:[%s3754_s17 + $0x28] sm:$0xff]  }
 0x2cd   :  { %v567_v5 = vpop.f32.mrf.mxu0  ;;  %v584_v6 = vsel %vm583_vm4, %v581_v3, -inf }
 0x2ce   :  { %v572_v7 = vmul.f32 0.125, %v567_v5  ;;  %585 = vmax.xlane.f32.xlu1 %v584_v6  ;;  %v3490_v5 = vld [vmem:[%s3754_s17 + $0x18] sm:$0xff]  }
 0x2cf   :  { %v3142_v8 = vpop.f32.mrf.mxu0 }
 0x2d0   :  { %v582_v9 = vsel %vm580_vm3, %v572_v7, -1e+30  ;;  %vm2008_vm3 = vcmask 15360  }
 0x2d1   :  { %v587_v10 = vsel %vm583_vm4, %v582_v9, -inf }
 0x2d2   :  { %588 = vmax.xlane.f32.xlu1 %v587_v10 }
 0x357   :  { %v586_v11 = vpop.xlane.xlu1 %585 }
 0x358   :  { %v590_v12 = vsub.f32 %v581_v3, %v586_v11  ;;  %v3489_v3 = vld [vmem:[%s3754_s17 + $0x20] sm:$0xff]  }
 0x35a   :  { %v592_v13 = vmul.f32 1.442695, %v590_v12 }
 0x35b   :  { %v589_v14 = vpop.xlane.xlu1 %588 }
 0x35c   :  { %3555 = vpow2.f32 %v592_v13  ;;  %v591_v15 = vsub.f32 %v582_v9, %v589_v14  ;;  %v2785_v14 = vld [vmem:[%s4294_s0] ss:$0 sm:$0xff] }
 0x35e   :  { %v594_v16 = vmul.f32 1.442695, %v591_v15 }
 0x360   :  { %3557 = vpow2.f32 %v594_v16 }
 0x369   :  { %v3556_v17 = vpop.eup %3555 }
 0x36a   :  { %v596_v18 = vsel %vm583_vm4, %v3556_v17, 0.0 }
 0x36b   :  { %597 = vadd.xlane.f32.xlu0 %v596_v18  ;;  %v2786_v18 = vld [vmem:[%s4295_s5] ss:$0 sm:$0xff] }
 0x36d   :  { %v3558_v19 = vpop.eup %3557 }
 0x36e   :  { %v599_v20 = vsel %vm583_vm4, %v3558_v19, 0.0 }
 0x36f   :  { %600 = vadd.xlane.f32.xlu1 %v599_v20 }
 0x3f4   :  { %v598_v23 = vpop.xlane.xlu0 %597 }
 0x3f5   :  { %3559 = vrcp.f32 %v598_v23  ;;  %v3491_v23 = vld [vmem:[%s3754_s17 + $0x10] sm:$0xff]  }
 0x3f8   :  { %v601_v24 = vpop.xlane.xlu1 %600 }
 0x3f9   :  { %3561 = vrcp.f32 %v601_v24  ;;  %v3492_v24 = vld [vmem:[%s3754_s17 + $0x8] sm:$0xff]  }
 0x402   :  { %v3560_v25 = vpop.eup %3559 }
 0x403   :  { %v604_v27 = vmul.f32 %v3560_v25, %v3556_v17  ;;  %v3493_v25 = vld [vmem:[%s3754_s17] sm:$0xff]   ;;  %s4298_s17 = sld [smem:[#allocation7_spill]] }
 0x406   :  { %v3562_v26 = vpop.eup %3561 }
 0x407   :  { %v605_v28 = vmul.f32 %v3562_v26, %v3558_v19  ;;  %v2787_v26 = vld [vmem:[%s4296_s9] ss:$0 sm:$0xff] }
 0x409   :  { %v606_v29 = vpack.c.bf16 %v605_v28, %v604_v27 }
 0x40b   :  { %3146 = vmatmul.mubr.msk.bf16.vlgmr.msra.gmra.mxu1 %vm583_vm4, %v606_v29 }
 0x40c   :  { %3169 = vmatprep.mubr.msk.bf16.mxu1 %vm3644_vm0, %v3643_v2  ;;  %3162 = vmatpush3.bf16.msra.mxu1 %v3482_v59  ;;  %v1778_v59 = vld [vmem:[%s4299_s21] sm:$0xff] }
 0x40d   :  { %3163 = vmatprep.subr.bf16.mxu1 %v3643_v2 }
 0x410   :  { %3164 = vmatpush3.bf16.msra.mxu1 %v3483_v60  ;;  %v1718_v60 = vld [vmem:[%s4298_s17] sm:$0xff] }
 0x411   :  { %3165 = vmatprep.subr.bf16.mxu1 %v3643_v2 }
 0x414   :  { %3166 = vmatpush3.bf16.msra.mxu1 %v3484_v61 }
 0x415   :  { %3167 = vmatprep.subr.bf16.mxu1 %v3643_v2 }
 0x418   :  { %3168 = vmatpush3.bf16.msra.mxu1 %v3485_v62 }
 0x419   :  { %3193 = vmatprep.subr.bf16.mxu1 %v3643_v2 }
 0x4cb   :  { %v645_v32 = vpop.f32.mrf.mxu1 }
 0x4cd   :  { %v3147_v33 = vpop.f32.mrf.mxu1 }
 0x4cf   :  { %v648_v36 = vpop.f32.mrf.mxu1 }
 0x4d0   :  { %v660_v37 = vpack.c.bf16 %v648_v36, %v645_v32 }
 0x4d1   :  { %v3148_v38 = vpop.f32.mrf.mxu1 }
 0x4d2   :  { %3158 = vmatmul.mubr.msk.bf16.vlgmr.msra.gmra.mxu0 %vm331_vm1, %v660_v37  ;;  %v2793_v38 = vld [vmem:[%s4297_s13] ss:$0 sm:$0xff] }
 0x4d3   :  { %3189 = vmatprep.mubr.msk.bf16.mxu0 %vm3644_vm0, %v3643_v2  ;;  %3174 = vmatpush3.bf16.msra.mxu0 %v3486_v63  ;;  %v3994_v63 = vand.u32 127, %v576_v57 }
 0x4d4   :  { %3175 = vmatprep.subr.bf16.mxu0 %v3643_v2 }
 0x4d7   :  { %3176 = vmatpush3.bf16.msra.mxu0 %v3487_v0 }
 0x4d8   :  { %3177 = vmatprep.subr.bf16.mxu0 %v3643_v2 }
 0x4db   :  { %3178 = vmatpush3.bf16.msra.mxu0 %v3488_v1 }
 0x4dc   :  { %3179 = vmatprep.subr.bf16.mxu0 %v3643_v2 }
 0x4df   :  { %3180 = vmatpush3.bf16.msra.mxu0 %v3489_v3 }
 0x4e0   :  { %3181 = vmatprep.subr.bf16.mxu0 %v3643_v2 }
 0x4e3   :  { %3182 = vmatpush3.bf16.msra.mxu0 %v3490_v5 }
 0x4e4   :  { %3183 = vmatprep.subr.bf16.mxu0 %v3643_v2 }
 0x4e7   :  { %3184 = vmatpush3.bf16.msra.mxu0 %v3491_v23  ;;  %v4025_v23 = vld [vmem:[%s4302_s14] sm:$0xff]  }
 0x4e8   :  { %3185 = vmatprep.subr.bf16.mxu0 %v3643_v2 }
 0x4eb   :  { %3186 = vmatpush3.bf16.msra.mxu0 %v3492_v24  ;;  %v3495_v24 = vld [vmem:[%s4303_s19 + $0x18] sm:$0xff]  }
 0x4ec   :  { %3187 = vmatprep.subr.bf16.mxu0 %v3643_v2 }
 0x4ef   :  { %3188 = vmatpush3.bf16.msra.mxu0 %v3493_v25  ;;  %v3497_v25 = vld [vmem:[%s4303_s19 + $0x8] sm:$0xff]  }
 0x4f0   :  { %3223 = vmatprep.subr.bf16.mxu0 %v3643_v2 }
 0x592   :  { %v729_v40 = vpop.f32.mrf.mxu0 }
 0x593   :  { %v730_v41 = vadd.f32 %v2779_v39, %v729_v40 }
 0x594   :  { %v3159_v42 = vpop.f32.mrf.mxu0 }
 0x595   :  { %v736_v43 = vadd.f32 %v730_v41, %v3896_v34 }
 0x596   :  { %v732_v44 = vpop.f32.mrf.mxu0 }
 0x597   :  { %v733_v45 = vadd.f32 %v2779_v39, %v732_v44  ;;  %v740_v46 = vsel %vm331_vm1, %v736_v43, 0.0 }
 0x598   :  { %741 = vadd.xlane.f32.xlu1 %v740_v46  ;;  %v3160_v47 = vpop.f32.mrf.mxu0 }
 0x599   :  { %v737_v48 = vadd.f32 %v733_v45, %v3898_v35 }
 0x59b   :  { %v743_v49 = vsel %vm331_vm1, %v737_v48, 0.0 }
 0x59c   :  { %744 = vadd.xlane.f32.xlu1 %v743_v49 }
 0x621   :  { %v742_v50 = vpop.xlane.xlu1 %741 }
 0x622   :  { %v747_v51 = vmul.f32 0.015625, %v742_v50 }
 0x624   :  { %v749_v52 = vsub.f32 %v736_v43, %v747_v51 }
 0x625   :  { %v745_v53 = vpop.xlane.xlu1 %744 }
 0x626   :  { %v748_v54 = vmul.f32 0.015625, %v745_v53  ;;  %v751_v34 = vmul.f32 %v749_v52, %v749_v52 }
 0x628   :  { %v750_v55 = vsub.f32 %v737_v48, %v748_v54  ;;  %v753_v56 = vsel %vm331_vm1, %v751_v34, 0.0 }
 0x629   :  { %754 = vadd.xlane.f32.xlu1 %v753_v56 }
 0x62a   :  { %v752_v58 = vmul.f32 %v750_v55, %v750_v55 }
 0x62c   :  { %v756_v35 = vsel %vm331_vm1, %v752_v58, 0.0 }
 0x62d   :  { %757 = vadd.xlane.f32.xlu1 %v756_v35  ;;  %v1719_v35 = vld [vmem:[%s4298_s17 + $0x8] sm:$0xff] }
 0x6b2   :  { %v755_v6 = vpop.xlane.xlu1 %754 }
 0x6b3   :  { %v759_v7 = vmul.f32 0.015625, %v755_v6 }
 0x6b5   :  { %v761_v8 = vadd.f32 1e-05, %v759_v7 }
 0x6b6   :  { %v758_v9 = vpop.xlane.xlu1 %757 }
 0x6b7   :  { %3563 = vrsqrt.f32 %v761_v8  ;;  %v760_v10 = vmul.f32 0.015625, %v758_v9  ;;  %v3646_v9 = vmov 1  }
 0x6b9   :  { %v762_v11 = vadd.f32 1e-05, %v760_v10 }
 0x6bb   :  { %3565 = vrsqrt.f32 %v762_v11 }
 0x6c4   :  { %v3564_v12 = vpop.eup %3563 }
 0x6c5   :  { %v765_v13 = vmul.f32 %v3564_v12, %v749_v52 }
 0x6c7   :  { %v773_v17 = vmul.f32 %v2785_v14, %v765_v13 }
 0x6c8   :  { %v3566_v15 = vpop.eup %3565 }
 0x6c9   :  { %v766_v16 = vmul.f32 %v3566_v15, %v750_v55  ;;  %v781_v20 = vadd.f32 %v2786_v18, %v773_v17 }
 0x6cb   :  { %v774_v19 = vmul.f32 %v2785_v14, %v766_v16  ;;  %v2802_v14 = vld [vmem:[%s4300_s3] ss:$0 sm:$0xff] }
 0x6cd   :  { %v782_v21 = vadd.f32 %v2786_v18, %v774_v19  ;;  %v2803_v18 = vld [vmem:[%s4301_s8] ss:$0 sm:$0xff] }
 0x6cf   :  { %v791_v22 = vpack.c.bf16 %v782_v21, %v781_v20 }
 0x6d1   :  { %3170 = vmatmul.mubr.msk.bf16.vlgmr.msra.gmra.mxu1 %vm331_vm1, %v791_v22 }
 0x6d2   :  { %3195 = vmatprep.mubr.msk.bf16.mxu1 %vm3644_vm0, %v3643_v2 }
 0x791   :  { %v860_v27 = vpop.f32.mrf.mxu1 }
 0x792   :  { %v861_v29 = vadd.f32 %v2787_v26, %v860_v27  ;;  %v3499_v27 = vld [vmem:[%s4304_s24 + $0x18] sm:$0xff]  }
 0x793   :  { %v3171_v28 = vpop.f32.mrf.mxu1 }
 0x794   :  { %v867_v33 = vmax.f32 %v861_v29, 0.0  ;;  %v3500_v28 = vld [vmem:[%s4304_s24 + $0x10] sm:$0xff]   ;;  %v3501_v29 = vld [vmem:[%s4304_s24 + $0x8] sm:$0xff]  }
 0x795   :  { %v863_v30 = vpop.f32.mrf.mxu1 }
 0x796   :  { %v864_v31 = vadd.f32 %v2787_v26, %v863_v30  ;;  %v3498_v26 = vld [vmem:[%s4303_s19] sm:$0xff]  }
 0x797   :  { %v3172_v32 = vpop.f32.mrf.mxu1  ;;  %v3502_v30 = vld [vmem:[%s4304_s24] sm:$0xff]  }
 0x798   :  { %v868_v36 = vmax.f32 %v864_v31, 0.0 }
 0x79a   :  { %v885_v37 = vpack.c.bf16 %v868_v36, %v867_v33 }
 0x79c   :  { %3190 = vmatmul.mubr.bf16.vlgmr.msra.gmra.mxu0 %v885_v37 }
 0x79d   :  { %3225 = vmatprep.mubr.msk.bf16.mxu0 %vm3644_vm0, %v3643_v2 }
 0x85c   :  { %v975_v39 = vpop.f32.mrf.mxu0 }
 0x85d   :  { %v976_v40 = vadd.f32 %v2793_v38, %v975_v39 }
 0x85e   :  { %v3191_v41 = vpop.f32.mrf.mxu0 }
 0x85f   :  { %v982_v42 = vadd.f32 %v976_v40, %v781_v20 }
 0x860   :  { %v978_v43 = vpop.f32.mrf.mxu0 }
 0x861   :  { %v979_v44 = vadd.f32 %v2793_v38, %v978_v43  ;;  %v986_v45 = vsel %vm331_vm1, %v982_v42, 0.0  ;;  %v3508_v43 = vld [vmem:[%s4304_s24 + $0x30] sm:$0xff]  }
 0x862   :  { %987 = vadd.xlane.f32.xlu1 %v986_v45  ;;  %v3192_v46 = vpop.f32.mrf.mxu0  ;;  %v2816_v45 = vld [vmem:[%s4305_s30] ss:$0 sm:$0xff] }
 0x863   :  { %v983_v47 = vadd.f32 %v979_v44, %v782_v21 }
 0x865   :  { %v989_v48 = vsel %vm331_vm1, %v983_v47, 0.0 }
 0x866   :  { %990 = vadd.xlane.f32.xlu1 %v989_v48 }
 0x8eb   :  { %v988_v49 = vpop.xlane.xlu1 %987 }
 0x8ec   :  { %v992_v50 = vmul.f32 0.015625, %v988_v49 }
 0x8ee   :  { %v994_v51 = vsub.f32 %v982_v42, %v992_v50  ;;  %v3507_v42 = vld [vmem:[%s4304_s24 + $0x38] sm:$0xff]  }
 0x8ef   :  { %v991_v52 = vpop.xlane.xlu1 %990 }
 0x8f0   :  { %v993_v53 = vmul.f32 0.015625, %v991_v52  ;;  %v996_v54 = vmul.f32 %v994_v51, %v994_v51 }
 0x8f2   :  { %v995_v34 = vsub.f32 %v983_v47, %v993_v53  ;;  %v998_v55 = vsel %vm331_vm1, %v996_v54, 0.0 }
 0x8f3   :  { %999 = vadd.xlane.f32.xlu1 %v998_v55 }
 0x8f4   :  { %v997_v56 = vmul.f32 %v995_v34, %v995_v34 }
 0x8f6   :  { %v1001_v58 = vsel %vm331_vm1, %v997_v56, 0.0 }
 0x8f7   :  { %1002 = vadd.xlane.f32.xlu0 %v1001_v58 }
 0x904   :  { %1726 = vperm.xlu1 %3452, %v1719_v35  }
 0x908   :  { %1780 = vperm.xlu1 %3452, %v1778_v59  }
 0x90d   :  { %1723 = vperm.xlu0 %3451, %v1718_v60  }
 0x97c   :  { %v1000_v61 = vpop.xlane.xlu1 %999 }
 0x97d   :  { %v1004_v62 = vmul.f32 0.015625, %v1000_v61 }
 0x97f   :  { %v1006_v0 = vadd.f32 1e-05, %v1004_v62 }
 0x980   :  { %v1003_v1 = vpop.xlane.xlu0 %1002  ;;  %v3996_v3 = vpop.permute.xlu1 %1726 }
 0x981   :  { %3567 = vrsqrt.f32 %v1006_v0  ;;  %v1005_v5 = vmul.f32 0.015625, %v1003_v1  ;;  %vm1729_vm5 = vcmp.eq.s32.totalorder %v3996_v3, %v3994_v63  ;;  %v3519_v3 = vld [vmem:[%s4307_s12 + $0x38] sm:$0xff]  }
 0x982   :  { %v2876_v6 = vsel %vm1729_vm5, 1.0, %v3643_v2 }
 0x983   :  { %v1007_v7 = vadd.f32 1e-05, %v1005_v5  ;;  %vm1735_vm6 = vcmp.gt.f32.partialorder %v2876_v6, 0.0 }
 0x984   :  { %v1737_v57 = vsel %vm1735_vm6, 1, %v3645_v4 }
 0x985   :  { %3569 = vrsqrt.f32 %v1007_v7  ;;  %1742 = vperm.xlu0 %3451, %v1737_v57  }
 0x988   :  { %v4005_v8 = vpop.permute.xlu0 %1723 }
 0x989   :  { %vm1728_vm7 = vcmp.eq.s32.totalorder %v4005_v8, %v3994_v63  ;;  %3454 = vset.pattern.permute.xlu0 %v3646_v9  ;;  %v3523_v8 = vld [vmem:[%s4307_s12 + $0x28] sm:$0xff]  }
 0x98a   :  { %v2875_v10 = vsel %vm1728_vm7, 1.0, %v3643_v2  ;;  %1761 = vperm.xlu0 %3454, %v1737_v57  }
 0x98b   :  { %vm1734_vm8 = vcmp.gt.f32.partialorder %v2875_v10, 0.0 }
 0x98c   :  { %v1736_v11 = vsel %vm1734_vm8, 1, %v3645_v4 }
 0x98d   :  { %1739 = vperm.xlu1 %3452, %v1736_v11  }
 0x98e   :  { %v3568_v12 = vpop.eup %3567  ;;  %3456 = vset.pattern.permute.xlu0 %v3645_v4 }
 0x98f   :  { %v1010_v13 = vmul.f32 %v3568_v12, %v994_v51 }
 0x991   :  { %3453 = vset.pattern.permute.xlu1 %v3646_v9  ;;  %v1018_v17 = vmul.f32 %v2802_v14, %v1010_v13  ;;  %v3503_v13 = vld [vmem:[%s4303_s19 + $0x38] sm:$0xff]  }
 0x992   :  { %v3570_v15 = vpop.eup %3569  ;;  %1758 = vperm.xlu1 %3453, %v1736_v11  }
 0x993   :  { %v1011_v16 = vmul.f32 %v3570_v15, %v995_v34  ;;  %v4018_v20 = vadd.f32 %v2803_v18, %v1018_v17  ;;  %v3505_v15 = vld [vmem:[%s4303_s19 + $0x28] sm:$0xff]  }
 0x994   :  { %v3509_v17 = vld [vmem:[%s4304_s24 + $0x28] sm:$0xff]  }
 0x995   :  { %v1019_v19 = vmul.f32 %v2802_v14, %v1011_v16  ;;  %v3504_v14 = vld [vmem:[%s4303_s19 + $0x30] sm:$0xff]   ;;  %v3506_v16 = vld [vmem:[%s4303_s19 + $0x20] sm:$0xff]  }
 0x996   :  { %3455 = vset.pattern.permute.xlu1 %v3645_v4  ;;  %v3496_v4 = vld [vmem:[%s4303_s19 + $0x10] sm:$0xff]  }
 0x997   :  { %v4020_v21 = vadd.f32 %v2803_v18, %v1019_v19  ;;  %v3510_v18 = vld [vmem:[%s4304_s24 + $0x20] sm:$0xff]  }
 0x999   :  { %v1030_v22 = vpack.c.bf16 %v4020_v21, %v4018_v20 }
 0x99b   :  { %3194 = vmatpush3.bf16.msra.mxu1 %v1030_v22 }
 0x99c   :  { %3199 = vmatprep.subr.bf16.mxu1 %v3643_v2 }
 0x99e   :  { %3196 = vmatmul.mubr.msk.bf16.vlgmr.msra.gmra.mxu1 %vm583_vm4, %v4025_v23 }
 0x99f   :  { %3200 = vmatpush3.bf16.msra.mxu1 %v3495_v24  ;;  %3207 = vmatprep.mubr.msk.bf16.mxu1 %vm3644_vm0, %v3643_v2 }
 0x9a0   :  { %3201 = vmatprep.subr.bf16.mxu1 %v3643_v2 }
 0x9a3   :  { %3202 = vmatpush3.bf16.msra.mxu1 %v3496_v4 }
 0x9a4   :  { %3203 = vmatprep.subr.bf16.mxu1 %v3643_v2 }
 0x9a7   :  { %3204 = vmatpush3.bf16.msra.mxu1 %v3497_v25 }
 0x9a8   :  { %3205 = vmatprep.subr.bf16.mxu1 %v3643_v2 }
 0x9ab   :  { %3206 = vmatpush3.bf16.msra.mxu1 %v3498_v26 }
 0x9ac   :  { %3211 = vmatprep.subr.bf16.mxu1 %v3643_v2 }
 0x9ae   :  { %3208 = vmatmul.mubr.msk.bf16.vlgmr.msra.gmra.mxu1 %vm331_vm1, %v1030_v22 }
 0x9af   :  { %3212 = vmatpush3.bf16.msra.mxu1 %v3499_v27  ;;  %3219 = vmatprep.mubr.msk.bf16.mxu1 %vm3644_vm0, %v3643_v2 }
 0x9b0   :  { %3213 = vmatprep.subr.bf16.mxu1 %v3643_v2 }
 0x9b3   :  { %3214 = vmatpush3.bf16.msra.mxu1 %v3500_v28  ;;  %v3511_v28 = vld [vmem:[%s4303_s19 + $0x58] sm:$0xff]  }
 0x9b4   :  { %3215 = vmatprep.subr.bf16.mxu1 %v3643_v2 }
 0x9b7   :  { %3216 = vmatpush3.bf16.msra.mxu1 %v3501_v29  ;;  %v3512_v29 = vld [vmem:[%s4303_s19 + $0x50] sm:$0xff]  }
 0x9b8   :  { %3217 = vmatprep.subr.bf16.mxu1 %v3643_v2 }
 0x9bb   :  { %3218 = vmatpush3.bf16.msra.mxu1 %v3502_v30  ;;  %v3513_v30 = vld [vmem:[%s4303_s19 + $0x48] sm:$0xff]  }
 0x9bc   :  { %3241 = vmatprep.subr.bf16.mxu1 %v3643_v2 }
 0xa5e   :  { %v1073_v31 = vpop.f32.mrf.mxu1 }
 0xa60   :  { %v3197_v32 = vpop.f32.mrf.mxu1 }
 0xa62   :  { %v1076_v33 = vpop.f32.mrf.mxu1 }
 0xa63   :  { %v1088_v36 = vpack.c.bf16 %v1076_v33, %v1073_v31  ;;  %v3514_v31 = vld [vmem:[%s4303_s19 + $0x40] sm:$0xff]  }
 0xa64   :  { %v3198_v37 = vpop.f32.mrf.mxu1  ;;  %v2845_v33 = vld [vmem:[%s4305_s30 + $0x1] ss:$0 sm:$0xff] }
 0xa65   :  { %3220 = vmatmul.mubr.msk.bf16.vlgmr.msra.gmra.mxu1 %vm331_vm1, %v1088_v36 }
 0xa66   :  { %3249 = vmatprep.mubr.msk.bf16.mxu1 %vm3644_vm0, %v3643_v2  ;;  %3242 = vmatpush3.bf16.msra.mxu1 %v3507_v42 }
 0xa67   :  { %3243 = vmatprep.subr.bf16.mxu1 %v3643_v2 }
 0xa6a   :  { %3244 = vmatpush3.bf16.msra.mxu1 %v3508_v43 }
 0xa6b   :  { %3245 = vmatprep.subr.bf16.mxu1 %v3643_v2 }
 0xa6e   :  { %v1158_v38 = vpop.f32.mrf.mxu1  ;;  %3246 = vmatpush3.bf16.msra.mxu1 %v3509_v17  ;;  %v3647_v17 = vmov 1.0  }
 0xa6f   :  { %3247 = vmatprep.subr.bf16.mxu1 %v3643_v2 }
 0xa70   :  { %v3209_v39 = vpop.f32.mrf.mxu1 }
 0xa72   :  { %v1161_v40 = vpop.f32.mrf.mxu1  ;;  %3248 = vmatpush3.bf16.msra.mxu1 %v3510_v18 }
 0xa73   :  { %3259 = vmatprep.subr.bf16.mxu1 %v3643_v2 }
 0xa74   :  { %v3210_v41 = vpop.f32.mrf.mxu1 }
 0xb25   :  { %v1226_v44 = vpop.f32.mrf.mxu1 }
 0xb26   :  { %v1227_v46 = vadd.f32 %v1226_v44, %v1158_v38 }
 0xb27   :  { %v3221_v47 = vpop.f32.mrf.mxu1 }
 0xb28   :  { %v1240_v48 = vadd.f32 %v2816_v45, %v1227_v46 }
 0xb29   :  { %v1229_v49 = vpop.f32.mrf.mxu1 }
 0xb2a   :  { %v1242_v50 = vmul.f32 %v1240_v48, %v1240_v48  ;;  %v1230_v51 = vadd.f32 %v1229_v49, %v1161_v40 }
 0xb2b   :  { %v3222_v52 = vpop.f32.mrf.mxu1 }
 0xb2c   :  { %v1244_v53 = vmul.f32 %v1242_v50, %v1240_v48  ;;  %v1241_v54 = vadd.f32 %v2816_v45, %v1230_v51 }
 0xb2e   :  { %v1246_v34 = vmul.f32 0.044715, %v1244_v53  ;;  %v1243_v55 = vmul.f32 %v1241_v54, %v1241_v54 }
 0xb30   :  { %v1248_v56 = vadd.f32 %v1246_v34, %v1240_v48  ;;  %v1245_v58 = vmul.f32 %v1243_v55, %v1241_v54 }
 0xb32   :  { %v1250_v35 = vmul.f32 0.7978846, %v1248_v56  ;;  %v1247_v59 = vmul.f32 0.044715, %v1245_v58 }
 0xb34   :  { %3571 = vtanh.f32 %v1250_v35  ;;  %v1249_v60 = vadd.f32 %v1247_v59, %v1241_v54 }
 0xb36   :  { %v1251_v61 = vmul.f32 0.7978846, %v1249_v60 }
 0xb38   :  { %3573 = vtanh.f32 %v1251_v61 }
 0xb41   :  { %v3572_v62 = vpop.eup %3571 }
 0xb42   :  { %v1254_v0 = vadd.f32 1.0, %v3572_v62 }
 0xb44   :  { %v1256_v1 = vmul.f32 0.5, %v1254_v0  ;;  %v3515_v0 = vld [vmem:[%s4304_s24 + $0x58] sm:$0xff]  }
 0xb45   :  { %v3574_v5 = vpop.eup %3573 }
 0xb46   :  { %v1255_v6 = vadd.f32 1.0, %v3574_v5  ;;  %v1258_v7 = vmul.f32 %v1256_v1, %v1240_v48  ;;  %v3516_v1 = vld [vmem:[%s4304_s24 + $0x50] sm:$0xff]   ;;  %v3517_v5 = vld [vmem:[%s4304_s24 + $0x48] sm:$0xff]  }
 0xb48   :  { %v1257_v57 = vmul.f32 0.5, %v1255_v6  ;;  %v4060_v10 = vadd.f32 %v1258_v7, %v4018_v20  ;;  %v3518_v6 = vld [vmem:[%s4304_s24 + $0x40] sm:$0xff]  }
 0xb49   :  { %v1785_v7 = vld [vmem:[%s4306_s6] sm:$0xff] }
 0xb4a   :  { %v1259_v9 = vmul.f32 %v1257_v57, %v1241_v54  ;;  %1787 = vperm.xlu1 %3455, %v1785_v7  }
 0xb4c   :  { %v4063_v11 = vadd.f32 %v1259_v9, %v4020_v21 }
 0xb4e   :  { %v1262_v12 = vpack.c.bf16 %v4063_v11, %v4060_v10 }
 0xb50   :  { %3224 = vmatpush3.bf16.msra.mxu0 %v1262_v12 }
 0xb51   :  { %3229 = vmatprep.subr.bf16.mxu0 %v3643_v2 }
 0xb53   :  { %3226 = vmatmul.mubr.msk.bf16.vlgmr.msra.gmra.mxu0 %vm583_vm4, %v4025_v23 }
 0xb54   :  { %3230 = vmatpush3.bf16.msra.mxu0 %v3503_v13  ;;  %3237 = vmatprep.mubr.msk.bf16.mxu0 %vm3644_vm0, %v3643_v2 }
 0xb55   :  { %3231 = vmatprep.subr.bf16.mxu0 %v3643_v2 }
 0xb58   :  { %3232 = vmatpush3.bf16.msra.mxu0 %v3504_v14 }
 0xb59   :  { %3233 = vmatprep.subr.bf16.mxu0 %v3643_v2 }
 0xb5c   :  { %3234 = vmatpush3.bf16.msra.mxu0 %v3505_v15 }
 0xb5d   :  { %3235 = vmatprep.subr.bf16.mxu0 %v3643_v2 }
 0xb60   :  { %3236 = vmatpush3.bf16.msra.mxu0 %v3506_v16  ;;  %v1781_v16 = vpop.permute.xlu1 %1780 }
 0xb61   :  { %3253 = vmatprep.subr.bf16.mxu0 %v3643_v2  ;;  %vm1782_vm9 = vcmp.eq.s32.totalorder %v1781_v16, %v3994_v63 }
 0xb62   :  { %v4137_v18 = vsel %vm1782_vm9, 1.0, %v3643_v2 }
 0xb63   :  { %3238 = vmatmul.mubr.msk.bf16.vlgmr.msra.gmra.mxu0 %vm331_vm1, %v1262_v12 }
 0xb64   :  { %3255 = vmatprep.mubr.msk.bf16.mxu0 %vm3644_vm0, %v3643_v2 }
 0xc13   :  { %v1297_v19 = vpop.f32.mrf.mxu0 }
 0xc15   :  { %v3227_v20 = vpop.f32.mrf.mxu0 }
 0xc17   :  { %v1300_v21 = vpop.f32.mrf.mxu0 }
 0xc18   :  { %v1313_v22 = vpack.c.bf16 %v1300_v21, %v1297_v19  ;;  %v3521_v19 = vld [vmem:[%s4307_s12 + $0x30] sm:$0xff]   ;;  %v2874_v21 = vld [vmem:[%s4305_s30 + $0x2] ss:$0 sm:$0xff] }
 0xc19   :  { %v3228_v24 = vpop.f32.mrf.mxu0 }
 0xc1a   :  { %3250 = vmatmul.mubr.msk.bf16.vlgmr.msra.gmra.mxu1 %vm331_vm1, %v1313_v22 }
 0xc1b   :  { %3267 = vmatprep.mubr.msk.bf16.mxu1 %vm3644_vm0, %v3643_v2  ;;  %3260 = vmatpush3.bf16.msra.mxu1 %v3511_v28 }
 0xc1c   :  { %3261 = vmatprep.subr.bf16.mxu1 %v3643_v2 }
 0xc1f   :  { %3262 = vmatpush3.bf16.msra.mxu1 %v3512_v29 }
 0xc20   :  { %3263 = vmatprep.subr.bf16.mxu1 %v3643_v2 }
 0xc23   :  { %v1384_v4 = vpop.f32.mrf.mxu0  ;;  %3264 = vmatpush3.bf16.msra.mxu1 %v3513_v30 }
 0xc24   :  { %3265 = vmatprep.subr.bf16.mxu1 %v3643_v2 }
 0xc25   :  { %v3239_v25 = vpop.f32.mrf.mxu0 }
 0xc27   :  { %v1387_v26 = vpop.f32.mrf.mxu0  ;;  %3266 = vmatpush3.bf16.msra.mxu1 %v3514_v31 }
 0xc28   :  { %3283 = vmatprep.subr.mxu1 %v3643_v2 }
 0xc29   :  { %v3240_v27 = vpop.f32.mrf.mxu0 }
 0xcda   :  { %v1452_v32 = vpop.f32.mrf.mxu1 }
 0xcdb   :  { %v1453_v36 = vadd.f32 %v1452_v32, %v1384_v4 }
 0xcdc   :  { %v3251_v37 = vpop.f32.mrf.mxu1 }
 0xcdd   :  { %v1467_v38 = vadd.f32 %v2845_v33, %v1453_v36 }
 0xcde   :  { %v1455_v39 = vpop.f32.mrf.mxu1 }
 0xcdf   :  { %v1469_v40 = vmul.f32 %v1467_v38, %v1467_v38  ;;  %v1456_v41 = vadd.f32 %v1455_v39, %v1387_v26 }
 0xce0   :  { %v3252_v42 = vpop.f32.mrf.mxu1 }
 0xce1   :  { %v1471_v43 = vmul.f32 %v1469_v40, %v1467_v38  ;;  %v1468_v44 = vadd.f32 %v2845_v33, %v1456_v41 }
 0xce3   :  { %v1473_v45 = vmul.f32 0.044715, %v1471_v43  ;;  %v1470_v46 = vmul.f32 %v1468_v44, %v1468_v44 }
 0xce5   :  { %v1475_v47 = vadd.f32 %v1473_v45, %v1467_v38  ;;  %v1472_v48 = vmul.f32 %v1470_v46, %v1468_v44 }
 0xce7   :  { %v1477_v49 = vmul.f32 0.7978846, %v1475_v47  ;;  %v1474_v50 = vmul.f32 0.044715, %v1472_v48  ;;  %v1743_v48 = vpop.permute.xlu0 %1742 }
 0xce8   :  { %vm1745_vm12 = vcmp.eq.s32.totalorder %v1743_v48, 1 }
 0xce9   :  { %3575 = vtanh.f32 %v1477_v49  ;;  %v1476_v51 = vadd.f32 %v1474_v50, %v1468_v44 }
 0xceb   :  { %v1478_v52 = vmul.f32 0.7978846, %v1476_v51 }
 0xced   :  { %3577 = vtanh.f32 %v1478_v52 }
 0xcf6   :  { %v3576_v53 = vpop.eup %3575 }
 0xcf7   :  { %v1481_v54 = vadd.f32 1.0, %v3576_v53 }
 0xcf9   :  { %v1483_v34 = vmul.f32 0.5, %v1481_v54  ;;  %v1762_v54 = vpop.permute.xlu0 %1761 }
 0xcfa   :  { %v3578_v55 = vpop.eup %3577  ;;  %vm1764_vm13 = vcmp.eq.s32.totalorder %v1762_v54, 1 }
 0xcfb   :  { %v1482_v56 = vadd.f32 1.0, %v3578_v55  ;;  %v1485_v58 = vmul.f32 %v1483_v34, %v1467_v38 }
 0xcfd   :  { %v1484_v35 = vmul.f32 0.5, %v1482_v56  ;;  %v4100_v60 = vadd.f32 %v1485_v58, %v4060_v10 }
 0xcff   :  { %v1486_v59 = vmul.f32 %v1484_v35, %v1468_v44  ;;  %v1740_v44 = vpop.permute.xlu1 %1739 }
 0xd00   :  { %vm1744_vm10 = vcmp.eq.s32.totalorder %v1740_v44, 1  ;;  %v3538_v44 = vld [vmem:[%s4308_s4] sm:$0xff]  }
 0xd01   :  { %v4103_v61 = vadd.f32 %v1486_v59, %v4063_v11 }
 0xd03   :  { %v1489_v62 = vpack.c.bf16 %v4103_v61, %v4100_v60  ;;  %v1759_v51 = vpop.permute.xlu1 %1758 }
 0xd04   :  { %vm1763_vm11 = vcmp.eq.s32.totalorder %v1759_v51, 1 }
 0xd05   :  { %3254 = vmatpush3.bf16.msra.mxu0 %v1489_v62  ;;  %3268 = vmatmul.mubr.msk.bf16.vlgmr.msra.gmra.mxu1 %vm331_vm1, %v1489_v62 }
 0xd06   :  { %3271 = vmatprep.subr.bf16.mxu0 %v3643_v2  ;;  %3287 = vmatprep.mubr.msk.f32.mxu1 %vm3644_vm0, %v3643_v2 }
 0xd07   :  { %v1788_v55 = vpop.permute.xlu1 %1787 }
 0xd08   :  { %3256 = vmatmul.mubr.msk.bf16.vlgmr.msra.gmra.mxu0 %vm583_vm4, %v4025_v23  ;;  %vm1789_vm14 = vcmp.eq.s32.totalorder %v1788_v55, %v3994_v63 }
 0xd09   :  { %3272 = vmatpush3.bf16.msra.mxu0 %v3515_v0  ;;  %3279 = vmatprep.mubr.msk.bf16.mxu0 %vm3644_vm0, %v3643_v2  ;;  %v2878_v63 = vsel %vm1789_vm14, 1.0, %v3643_v2 }
 0xd0a   :  { %3273 = vmatprep.subr.bf16.mxu0 %v3643_v2 }
 0xd0d   :  { %3274 = vmatpush3.bf16.msra.mxu0 %v3516_v1 }
 0xd0e   :  { %3275 = vmatprep.subr.bf16.mxu0 %v3643_v2 }
 0xd11   :  { %3276 = vmatpush3.bf16.msra.mxu0 %v3517_v5 }
 0xd12   :  { %3277 = vmatprep.subr.bf16.mxu0 %v3643_v2 }
 0xd15   :  { %3278 = vmatpush3.bf16.msra.mxu0 %v3518_v6 }
 0xd16   :  { %3297 = vmatprep.subr.mxu0 %v3643_v2 }
 0xdc5   :  { %v1611_v23 = vpop.f32.mrf.mxu1 }
 0xdc7   :  { %v3269_v57 = vpop.f32.mrf.mxu1 }
 0xdc8   :  { %v1524_v9 = vpop.f32.mrf.mxu0 }
 0xdc9   :  { %v1614_v10 = vpop.f32.mrf.mxu1 }
 0xdca   :  { %v3257_v11 = vpop.f32.mrf.mxu0 }
 0xdcb   :  { %v3270_v12 = vpop.f32.mrf.mxu1 }
 0xdcc   :  { %v1527_v13 = vpop.f32.mrf.mxu0 }
 0xdcd   :  { %v1540_v14 = vpack.c.bf16 %v1527_v13, %v1524_v9 }
 0xdce   :  { %v3258_v15 = vpop.f32.mrf.mxu0 }
 0xdcf   :  { %3280 = vmatmul.mubr.msk.bf16.vlgmr.msra.gmra.mxu0 %vm331_vm1, %v1540_v14 }
 0xdd0   :  { %3298 = vmatpush3.msk.msra.mxu0 %vm1729_vm5, %v3647_v17  ;;  %3301 = vmatprep.mubr.msk.f32.mxu0 %vm3644_vm0, %v3643_v2 }
 0xdd1   :  { %3299 = vmatprep.subr.mxu0 %v3643_v2 }
 0xdd2   :  { %3300 = vmatpush3.msk.msra.mxu0 %vm1728_vm7, %v3647_v17 }
 0xdd3   :  { %3309 = vmatprep.subr.bf16.mxu0 %v3643_v2 }
 0xdd7   :  { %3302 = vmatmul.mubr.msk.f32.vlgmr.msra.gmra.mxu0 %vm583_vm4, %v4137_v18 }
 0xdd8   :  { %3317 = vmatprep.mubr.msk.bf16.mxu0 %vm3644_vm0, %v3643_v2  ;;  %3310 = vmatpush3.bf16.msra.mxu0 %v3519_v3 }
 0xdd9   :  { %3311 = vmatprep.subr.bf16.mxu0 %v3643_v2 }
 0xddc   :  { %3312 = vmatpush3.bf16.msra.mxu0 %v3521_v19  ;;  %v3522_v19 = vld [vmem:[%s4307_s12 + $0x10] sm:$0xff]  }
 0xddd   :  { %3313 = vmatprep.subr.bf16.mxu0 %v3643_v2 }
 0xde0   :  { %3314 = vmatpush3.bf16.msra.mxu0 %v3523_v8  ;;  %v3524_v8 = vld [vmem:[%s4307_s12 + $0x8] sm:$0xff]  }
 0xde1   :  { %3315 = vmatprep.subr.bf16.mxu0 %v3643_v2 }
 0xe8f   :  { %v1679_v20 = vpop.f32.mrf.mxu0 }
 0xe90   :  { %v1680_v22 = vadd.f32 %v1679_v20, %v1611_v23  ;;  %v3525_v20 = vld [vmem:[%s4307_s12 + $0x20] sm:$0xff]  }
 0xe91   :  { %v3281_v24 = vpop.f32.mrf.mxu0  ;;  %3316 = vmatpush3.bf16.msra.mxu0 %v3525_v20 }
 0xe92   :  { %v1694_v4 = vadd.f32 %v2874_v21, %v1680_v22  ;;  %3333 = vmatprep.subr.bf16.mxu0 %v3643_v2 }
 0xe93   :  { %v1682_v25 = vpop.f32.mrf.mxu0 }
 0xe94   :  { %v1696_v26 = vmul.f32 %v1694_v4, %v1694_v4  ;;  %v1683_v27 = vadd.f32 %v1682_v25, %v1614_v10  ;;  %v3527_v25 = vld [vmem:[%s4307_s12 + $0x58] sm:$0xff]  }
 0xe95   :  { %v3282_v28 = vpop.f32.mrf.mxu0 }
 0xe96   :  { %v1698_v29 = vmul.f32 %v1696_v26, %v1694_v4  ;;  %v1695_v30 = vadd.f32 %v2874_v21, %v1683_v27  ;;  %v3526_v21 = vld [vmem:[%s4307_s12] sm:$0xff]   ;;  %v3531_v28 = vld [vmem:[%s4308_s4 + $0x38] sm:$0xff]  }
 0xe97   :  { %v4150_v31 = vpop.f32.mrf.mxu0 }
 0xe98   :  { %v1700_v32 = vmul.f32 0.044715, %v1698_v29  ;;  %v1697_v33 = vmul.f32 %v1695_v30, %v1695_v30 }
 0xe99   :  { %v3303_v36 = vpop.f32.mrf.mxu0 }
 0xe9a   :  { %v1702_v37 = vadd.f32 %v1700_v32, %v1694_v4  ;;  %v1699_v38 = vmul.f32 %v1697_v33, %v1695_v30  ;;  %v3530_v33 = vld [vmem:[%s4307_s12 + $0x40] sm:$0xff]  }
 0xe9c   :  { %v1704_v39 = vmul.f32 0.7978846, %v1702_v37  ;;  %v1701_v40 = vmul.f32 0.044715, %v1699_v38  ;;  %v3532_v38 = vld [vmem:[%s4308_s4 + $0x30] sm:$0xff]  }
 0xe9e   :  { %3579 = vtanh.f32 %v1704_v39  ;;  %v1703_v41 = vadd.f32 %v1701_v40, %v1695_v30  ;;  %v3533_v39 = vld [vmem:[%s4308_s4 + $0x28] sm:$0xff]   ;;  %v3534_v40 = vld [vmem:[%s4308_s4 + $0x20] sm:$0xff]  }
 0xea0   :  { %v1705_v42 = vmul.f32 0.7978846, %v1703_v41  ;;  %v3535_v41 = vld [vmem:[%s4308_s4 + $0x18] sm:$0xff]  }
 0xea2   :  { %3581 = vtanh.f32 %v1705_v42  ;;  %v3536_v42 = vld [vmem:[%s4308_s4 + $0x10] sm:$0xff]  }
 0xeab   :  { %v3580_v43 = vpop.eup %3579 }
 0xeac   :  { %v1708_v45 = vadd.f32 1.0, %v3580_v43  ;;  %v3537_v43 = vld [vmem:[%s4308_s4 + $0x8] sm:$0xff]  }
 0xeae   :  { %v1710_v46 = vmul.f32 0.5, %v1708_v45 }
 0xeaf   :  { %v3582_v47 = vpop.eup %3581 }
 0xeb0   :  { %v1712_v49 = vmul.f32 %v1710_v46, %v1694_v4  ;;  %v1709_v50 = vadd.f32 1.0, %v3582_v47 }
 0xeb2   :  { %v1711_v52 = vmul.f32 0.5, %v1709_v50  ;;  %v1714_v53 = vadd.f32 %v1712_v49, %v4100_v60 }
 0xeb4   :  { %v1713_v34 = vmul.f32 %v1711_v52, %v1695_v30  ;;  %1716 = vst.msk [vmem:[#allocation3] sm:$0xff] %vm331_vm1, %v1714_v53  ;;  %v1746_v58 = vsel %vm1744_vm10, %v1714_v53, -3e+38  ;;  %v1765_v35 = vsel %vm1763_vm11, %v1714_v53, -3e+38  ;;  %v3528_v30 = vld [vmem:[%s4307_s12 + $0x50] sm:$0xff]  }
 0xeb5   :  { %v1748_v62 = vsel %vm331_vm1, %v1746_v58, -inf  ;;  %v1767_v1 = vsel %vm331_vm1, %v1765_v35, -inf }
 0xeb6   :  { %v1715_v56 = vadd.f32 %v1713_v34, %v4103_v61 }
 0xeb8   :  { %3284 = vmatpush3.msra.mxu1 %v1715_v56  ;;  %1717 = vst.msk [vmem:[#allocation3 + $0x8] sm:$0xff] %vm331_vm1, %v1715_v56  ;;  %v1747_v59 = vsel %vm1745_vm12, %v1715_v56, -3e+38  ;;  %v1766_v60 = vsel %vm1764_vm13, %v1715_v56, -3e+38 }
 0xeb9   :  { %3285 = vmatprep.subr.mxu1 %v3643_v2  ;;  %v1749_v0 = vsel %vm331_vm1, %v1747_v59, -inf  ;;  %v1768_v61 = vsel %vm331_vm1, %v1766_v60, -inf }
 0xeba   :  { %3286 = vmatpush3.msra.mxu1 %v1714_v53  ;;  %v1750_v5 = vmax.f32 %v1748_v62, %v1749_v0  ;;  %v1769_v6 = vmax.f32 %v1767_v1, %v1768_v61 }
 0xebb   :  { %3288 = vmatmul.mubr.msk.f32.vlgmr.msra.gmra.mxu1 %vm583_vm4, %v4137_v18  ;;  %3290 = vmatprep.subr.mxu1 %v3643_v2  ;;  %v3520_v18 = vld [vmem:[%s4307_s12 + $0x18] sm:$0xff]  }
 0xebc   :  { %3291 = vmatpush3.msra.mxu1 %v1715_v56  ;;  %3294 = vmatprep.mubr.msk.f32.mxu1 %vm3644_vm0, %v3643_v2  ;;  %v1751_v7 = vrot.slane %v1750_v5, 4  ;;  %v1770_v23 = vrot.slane %v1769_v6, 4 }
 0xebd   :  { %3292 = vmatprep.subr.mxu1 %v3643_v2 }
 0xebe   :  { %3293 = vmatpush3.msra.mxu1 %v1714_v53  ;;  %v1752_v57 = vmax.f32 %v1750_v5, %v1751_v7  ;;  %v1771_v9 = vmax.f32 %v1769_v6, %v1770_v23 }
 0xebf   :  { %3295 = vmatmul.mubr.msk.f32.vlgmr.msra.gmra.mxu1 %vm583_vm4, %v2878_v63  ;;  %3304 = vmatprep.subr.mxu1 %v3643_v2 }
 0xec0   :  { %v1753_v10 = vrot.slane %v1752_v57, 2  ;;  %v1772_v11 = vrot.slane %v1771_v9, 2  ;;  %3306 = vmatprep.mubr.msk.f32.mxu1 %vm3644_vm0, %v3643_v2 }
 0xec2   :  { %v1754_v12 = vmax.f32 %v1752_v57, %v1753_v10  ;;  %v1773_v13 = vmax.f32 %v1771_v9, %v1772_v11 }
 0xec4   :  { %v1755_v14 = vrot.slane %v1754_v12, 1  ;;  %v1774_v15 = vrot.slane %v1773_v13, 1 }
 0xec6   :  { %v1756_v16 = vmax.f32 %v1754_v12, %v1755_v14  ;;  %v1775_v17 = vmax.f32 %v1773_v13, %v1774_v15 }
 0xec8   :  { %v1777_v3 = vsel %vm1776_vm15, %v1756_v16, %v1775_v17  ;;  %v2918_v17 = vld [vmem:[%s4312_s16] ss:$0 sm:$0xff] }
 0xec9   :  { %3305 = vmatpush3.msk.msra.mxu1 %vm2012_vm2, %v1777_v3 }
 0xeca   :  { %3307 = vmatmul.mubr.msk.f32.vlgmr.msra.gmra.mxu1 %vm2008_vm3, %v4150_v31  ;;  %3321 = vmatprep.subr.bf16.mxu1 %v3643_v2  ;;  %v3529_v31 = vld [vmem:[%s4307_s12 + $0x48] sm:$0xff]  }
 0xecb   :  { %3322 = vmatpush3.bf16.msra.mxu1 %v3520_v18  ;;  %3329 = vmatprep.mubr.msk.bf16.mxu1 %vm3644_vm0, %v3643_v2 }
 0xecc   :  { %3323 = vmatprep.subr.bf16.mxu1 %v3643_v2 }
 0xecf   :  { %3324 = vmatpush3.bf16.msra.mxu1 %v3522_v19 }
 0xed0   :  { %3325 = vmatprep.subr.bf16.mxu1 %v3643_v2 }
 0xed3   :  { %3326 = vmatpush3.bf16.msra.mxu1 %v3524_v8 }
 0xed4   :  { %3327 = vmatprep.subr.bf16.mxu1 %v3643_v2 }
 0xed7   :  { %3328 = vmatpush3.bf16.msra.mxu1 %v3526_v21 }
 0xed8   :  { %3345 = vmatprep.subr.bf16.mxu1 %v3643_v2 }
 0xf7b   :  { %v1861_v22 = vpop.f32.mrf.mxu1 }
 0xf7c   :  { %2086 = vst.msk [vmem:[%s3832_s27] sm:$0xff] %vm331_vm1, %v1861_v22  ;;  %s4311_s27 = sld [smem:[#allocation25_spill]] }
 0xf7d   :  { %v3289_v24 = vpop.f32.mrf.mxu1 }
 0xf7f   :  { %v1934_v4 = vpop.f32.mrf.mxu1 }
 0xf80   :  { %2087 = vst.msk [vmem:[%s3837_s25] sm:$0xff] %vm331_vm1, %v1934_v4  ;;  %v2097_v26 = vpack.c.bf16 %v1934_v4, %v1861_v22  ;;  %v2107_v27 = vpack.c.bf16 %v1861_v22, %v1934_v4  ;;  %s4309_s25 = sld [smem:[#allocation23_spill]] }
 0xf81   :  { %v3296_v29 = vpop.f32.mrf.mxu1 }
 0xf82   :  { %3318 = vmatmul.mubr.msk.bf16.vlgmr.msra.gmra.mxu0 %vm331_vm1, %v2107_v27  ;;  %3330 = vmatmul.mubr.msk.bf16.vlgmr.msra.gmra.mxu1 %vm331_vm1, %v2097_v26  ;;  %v3547_v12 = vld [vmem:[%s4311_s27 + $0x38] sm:$0xff]   ;;  %v3548_v13 = vld [vmem:[%s4311_s27 + $0x30] sm:$0xff]   ;;  %v3549_v14 = vld [vmem:[%s4311_s27 + $0x28] sm:$0xff]  }
 0xf83   :  { %3334 = vmatpush3.bf16.msra.mxu0 %v3527_v25  ;;  %3341 = vmatprep.mubr.msk.bf16.mxu0 %vm3644_vm0, %v3643_v2  ;;  %v3550_v15 = vld [vmem:[%s4311_s27 + $0x20] sm:$0xff]   ;;  %v3551_v16 = vld [vmem:[%s4311_s27 + $0x18] sm:$0xff]   ;;  %v3552_v25 = vld [vmem:[%s4311_s27 + $0x10] sm:$0xff]  }
 0xf84   :  { %3335 = vmatprep.subr.bf16.mxu0 %v3643_v2  ;;  %3346 = vmatpush3.bf16.msra.mxu1 %v3531_v28  ;;  %v3553_v26 = vld [vmem:[%s4311_s27 + $0x8] sm:$0xff]   ;;  %v3554_v27 = vld [vmem:[%s4311_s27] sm:$0xff]  }
 0xf85   :  { %3347 = vmatprep.subr.bf16.mxu1 %v3643_v2  ;;  %3361 = vmatprep.mubr.msk.bf16.mxu1 %vm3644_vm0, %v3643_v2  ;;  %v2927_v28 = vld [vmem:[%s4313_s15] ss:$0 sm:$0xff] }
 0xf86   :  { %v3539_v45 = vld [vmem:[%s4309_s25 + $0x38] sm:$0xff]   ;;  %v3540_v46 = vld [vmem:[%s4309_s25 + $0x30] sm:$0xff]   ;;  %v3541_v47 = vld [vmem:[%s4309_s25 + $0x28] sm:$0xff]  }
 0xf87   :  { %3336 = vmatpush3.bf16.msra.mxu0 %v3528_v30  ;;  %v3542_v48 = vld [vmem:[%s4309_s25 + $0x20] sm:$0xff]   ;;  %v3543_v49 = vld [vmem:[%s4309_s25 + $0x18] sm:$0xff]   ;;  %v3544_v9 = vld [vmem:[%s4309_s25 + $0x10] sm:$0xff]  }
 0xf88   :  { %3337 = vmatprep.subr.bf16.mxu0 %v3643_v2  ;;  %3348 = vmatpush3.bf16.msra.mxu1 %v3532_v38  ;;  %v3545_v10 = vld [vmem:[%s4309_s25 + $0x8] sm:$0xff]   ;;  %v3546_v11 = vld [vmem:[%s4309_s25] sm:$0xff]  }
 0xf89   :  { %3349 = vmatprep.subr.bf16.mxu1 %v3643_v2 }
 0xf8a   :  { %v2082_v32 = vpop.f32.mrf.mxu1 }
 0xf8b   :  { %2088 = vst.msk [vmem:[%s3842_s20] sm:$0xff] %vm331_vm1, %v2082_v32  ;;  %3338 = vmatpush3.bf16.msra.mxu0 %v3529_v31  ;;  %v2253_v37 = vpack.c.bf16 %v2082_v32, %v2082_v32  ;;  %s4310_s20 = sld [smem:[#allocation20_spill]] }
 0xf8c   :  { %v3308_v36 = vpop.f32.mrf.mxu1  ;;  %3339 = vmatprep.subr.bf16.mxu0 %v3643_v2  ;;  %3350 = vmatpush3.bf16.msra.mxu1 %v3533_v39 }
 0xf8d   :  { %3351 = vmatprep.subr.bf16.mxu1 %v3643_v2 }
 0xf8f   :  { %3340 = vmatpush3.bf16.msra.mxu0 %v3530_v33 }
 0xf90   :  { %3365 = vmatprep.subr.bf16.mxu0 %v3643_v2  ;;  %3352 = vmatpush3.bf16.msra.mxu1 %v3534_v40 }
 0xf91   :  { %3353 = vmatprep.subr.bf16.mxu1 %v3643_v2  ;;  %v2917_v60 = vld [vmem:[%s4310_s20] ss:$0 sm:$0xff] }
 0xf92   :  { %3342 = vmatmul.mubr.msk.bf16.vlgmr.msra.gmra.mxu0 %vm331_vm1, %v2253_v37 }
 0xf93   :  { %3381 = vmatprep.mubr.msk.bf16.mxu0 %vm3644_vm0, %v3643_v2  ;;  %3366 = vmatpush3.bf16.msra.mxu0 %v3539_v45 }
 0xf94   :  { %3354 = vmatpush3.bf16.msra.mxu1 %v3535_v41  ;;  %3367 = vmatprep.subr.bf16.mxu0 %v3643_v2 }
 0xf95   :  { %3355 = vmatprep.subr.bf16.mxu1 %v3643_v2 }
 0xf97   :  { %3368 = vmatpush3.bf16.msra.mxu0 %v3540_v46 }
 0xf98   :  { %3356 = vmatpush3.bf16.msra.mxu1 %v3536_v42  ;;  %3369 = vmatprep.subr.bf16.mxu0 %v3643_v2 }
 0xf99   :  { %3357 = vmatprep.subr.bf16.mxu1 %v3643_v2 }
 0xf9b   :  { %3370 = vmatpush3.bf16.msra.mxu0 %v3541_v47 }
 0xf9c   :  { %3358 = vmatpush3.bf16.msra.mxu1 %v3537_v43  ;;  %3371 = vmatprep.subr.bf16.mxu0 %v3643_v2 }
 0xf9d   :  { %3359 = vmatprep.subr.bf16.mxu1 %v3643_v2 }
 0xf9f   :  { %3372 = vmatpush3.bf16.msra.mxu0 %v3542_v48 }
 0xfa0   :  { %3360 = vmatpush3.bf16.msra.mxu1 %v3538_v44  ;;  %3373 = vmatprep.subr.bf16.mxu0 %v3643_v2 }
 0xfa1   :  { %3385 = vmatprep.subr.bf16.mxu1 %v3643_v2 }
 0xfa3   :  { %3374 = vmatpush3.bf16.msra.mxu0 %v3543_v49 }
 0xfa4   :  { %3375 = vmatprep.subr.bf16.mxu0 %v3643_v2 }
 0xfa7   :  { %3376 = vmatpush3.bf16.msra.mxu0 %v3544_v9 }
 0xfa8   :  { %3377 = vmatprep.subr.bf16.mxu0 %v3643_v2 }
 0xfab   :  { %3378 = vmatpush3.bf16.msra.mxu0 %v3545_v10 }
 0xfac   :  { %3379 = vmatprep.subr.bf16.mxu0 %v3643_v2 }
 0xfaf   :  { %3380 = vmatpush3.bf16.msra.mxu0 %v3546_v11 }
0x1042   :  { %v2169_v50 = vpop.f32.mrf.mxu0  ;;  %v2237_v51 = vpop.f32.mrf.mxu1 }
0x1043   :  { %v2238_v58 = vadd.f32 %v2237_v51, %v2169_v50 }
0x1044   :  { %v3319_v52 = vpop.f32.mrf.mxu0  ;;  %v3331_v53 = vpop.f32.mrf.mxu1 }
0x1046   :  { %v2172_v54 = vpop.f32.mrf.mxu0  ;;  %v2240_v34 = vpop.f32.mrf.mxu1 }
0x1047   :  { %v2241_v0 = vadd.f32 %v2240_v34, %v2172_v54 }
0x1048   :  { %v3320_v55 = vpop.f32.mrf.mxu0  ;;  %v3332_v56 = vpop.f32.mrf.mxu1 }
0x1052   :  { %v2315_v35 = vpop.f32.mrf.mxu0 }
0x1053   :  { %v2322_v59 = vadd.f32 %v2315_v35, %v2238_v58 }
0x1054   :  { %v3343_v62 = vpop.f32.mrf.mxu0 }
0x1055   :  { %v2331_v61 = vadd.f32 %v2917_v60, %v2322_v59 }
0x1056   :  { %v2318_v1 = vpop.f32.mrf.mxu0 }
0x1057   :  { %v2323_v5 = vadd.f32 %v2318_v1, %v2241_v0  ;;  %v2333_v7 = vmax.f32 %v2331_v61, 0.0 }
0x1058   :  { %v3344_v6 = vpop.f32.mrf.mxu0 }
0x1059   :  { %v2332_v63 = vadd.f32 %v2917_v60, %v2323_v5 }
0x105b   :  { %v2334_v23 = vmax.f32 %v2332_v63, 0.0 }
0x105d   :  { %v2351_v57 = vpack.c.bf16 %v2334_v23, %v2333_v7 }
0x105f   :  { %3362 = vmatmul.mubr.bf16.vlgmr.msra.gmra.mxu1 %v2351_v57 }
0x1060   :  { %3401 = vmatprep.mubr.msk.bf16.mxu1 %vm3644_vm0, %v3643_v2  ;;  %3386 = vmatpush3.bf16.msra.mxu1 %v3547_v12 }
0x1061   :  { %3387 = vmatprep.subr.bf16.mxu1 %v3643_v2 }
0x1064   :  { %3388 = vmatpush3.bf16.msra.mxu1 %v3548_v13 }
0x1065   :  { %3389 = vmatprep.subr.bf16.mxu1 %v3643_v2 }
0x1068   :  { %3390 = vmatpush3.bf16.msra.mxu1 %v3549_v14 }
0x1069   :  { %3391 = vmatprep.subr.bf16.mxu1 %v3643_v2 }
0x106c   :  { %3392 = vmatpush3.bf16.msra.mxu1 %v3550_v15 }
0x106d   :  { %3393 = vmatprep.subr.bf16.mxu1 %v3643_v2 }
0x1070   :  { %3394 = vmatpush3.bf16.msra.mxu1 %v3551_v16 }
0x1071   :  { %3395 = vmatprep.subr.bf16.mxu1 %v3643_v2 }
0x1074   :  { %3396 = vmatpush3.bf16.msra.mxu1 %v3552_v25 }
0x1075   :  { %3397 = vmatprep.subr.bf16.mxu1 %v3643_v2 }
0x1078   :  { %3398 = vmatpush3.bf16.msra.mxu1 %v3553_v26 }
0x1079   :  { %3399 = vmatprep.subr.bf16.mxu1 %v3643_v2 }
0x107c   :  { %3400 = vmatpush3.bf16.msra.mxu1 %v3554_v27 }
0x111f   :  { %v2441_v18 = vpop.f32.mrf.mxu1 }
0x1120   :  { %v2442_v19 = vadd.f32 %v2918_v17, %v2441_v18 }
0x1121   :  { %v3363_v3 = vpop.f32.mrf.mxu1 }
0x1122   :  { %v2448_v22 = vmax.f32 %v2442_v19, 0.0 }
0x1123   :  { %v2444_v8 = vpop.f32.mrf.mxu1 }
0x1124   :  { %v2445_v20 = vadd.f32 %v2918_v17, %v2444_v8 }
0x1125   :  { %v3364_v21 = vpop.f32.mrf.mxu1 }
0x1126   :  { %v2449_v24 = vmax.f32 %v2445_v20, 0.0 }
0x1128   :  { %v2466_v4 = vpack.c.bf16 %v2449_v24, %v2448_v22 }
0x112a   :  { %3382 = vmatmul.mubr.bf16.vlgmr.msra.gmra.mxu0 %v2466_v4 }
0x11ea   :  { %v2556_v29 = vpop.f32.mrf.mxu0 }
0x11eb   :  { %v2557_v31 = vadd.f32 %v2927_v28, %v2556_v29 }
0x11ec   :  { %v3383_v30 = vpop.f32.mrf.mxu0 }
0x11ed   :  { %v2563_v37 = vmax.f32 %v2557_v31, 0.0 }
0x11ee   :  { %v2559_v32 = vpop.f32.mrf.mxu0 }
0x11ef   :  { %v2560_v33 = vadd.f32 %v2927_v28, %v2559_v32 }
0x11f0   :  { %v3384_v36 = vpop.f32.mrf.mxu0 }
0x11f1   :  { %v2564_v38 = vmax.f32 %v2560_v33, 0.0 }
0x11f3   :  { %v2581_v39 = vpack.c.bf16 %v2564_v38, %v2563_v37 }
0x11f5   :  { %3402 = vmatmul.mubr.bf16.vlgmr.msra.gmra.mxu1 %v2581_v39 }
0x11f6   :  { %3594 = shalt.err (!%p3591_p4)
}
0x11f7   :  { %s3649_s26 = smov 128   ;;  %s4314_s1 = sld [smem:[#allocation26_spill]]  ;;  %v2936_v2 = vld [vmem:[#allocation2] ss:$0 sm:$0xff]  ;;  %vm2678_vm0 = vcmask 7168  }
0x11f8   :  { %s3650_s28 = smov 8  }
0x11fd   :  { %2692 = dma.vmem_to_hbm [thread:$0]  %s2687_s23, 256, %s4314_s1, [#allocation4], %s3649_s26, %s3649_s26, %s3650_s28  }
0x12b5   :  { %v2671_v40 = vpop.f32.mrf.mxu1 }
0x12b6   :  { %v2672_v41 = vadd.f32 %v2936_v2, %v2671_v40 }
0x12b7   :  { %v3403_v42 = vpop.f32.mrf.mxu1 }
0x12b8   :  { %2679 = vst.msk [vmem:[%s3847_s29] sm:$0xff] %vm2678_vm0, %v2672_v41 }
0x12b9   :  { %v2674_v43 = vpop.f32.mrf.mxu1 }
0x12ba   :  { %v2675_v44 = vadd.f32 %v2936_v2, %v2674_v43 }
0x12bb   :  { %v3404_v45 = vpop.f32.mrf.mxu1 }
0x12bc   :  { %2680 = vst.msk [vmem:[%s3847_s29 + $0x8] sm:$0xff] %vm2678_vm0, %v2675_v44 }
0x12bd   :  { %3603 = dma.done.wait [#allocation4], 256  }
0x12be   :  { %3604 = vsyncadd [#allocation4], 4294967040 }
0x12bf   :  { %2712 = vsyncpa [#allocation4], 1 }

</bundles_post_ra>
